<compile_context>
chip_gen: v6e
topology: v6e:2x2x1
jax: 0.10.0
libtpu: 0.0.40
codegen_flags: <defaults>
</compile_context>

<pallas_src>
import functools

import jax
import jax.numpy as jnp
import numpy as np
from jax import lax
from jax.experimental import pallas as pl
from jax.experimental.pallas import tpu as pltpu


def _round_up(n, m):
    return ((n + m - 1) // m) * m


def _vmem_capacity_bytes():
    """Physical per-core VMEM; conservative 64 MiB (v7x per-TC) fallback."""
    try:
        cap = int(pltpu.get_tpu_info().vmem_capacity_bytes)
        if cap > 0:
            return cap
    except Exception:
        pass
    return 64 << 20


def orthsgnn_kernel(h_ref, a_top_hbm, a_bot_hbm, mf_ref, out_ref,
                    a_top, a_bot, copy_sem, *, K, C):
    prop_dt = a_top.dtype   # bf16 (default) or f32 MXU operands; carries/acc stay f32

    # Manual A_hat DMA in two row-halves: the bottom half's HBM->VMEM transfer
    # overlaps the top half's first MXU pass of P1 = A_hat @ h.
    cp_top = pltpu.make_async_copy(a_top_hbm, a_top, copy_sem.at[0])
    cp_bot = pltpu.make_async_copy(a_bot_hbm, a_bot, copy_sem.at[1])
    cp_top.start()
    cp_bot.start()

    h = h_ref[...]                       # P0 (f32, precomputed Linear embedding)
    h_prop = h.astype(prop_dt)

    cp_top.wait()
    p1_top = jnp.dot(a_top[...], h_prop, preferred_element_type=jnp.float32)
    cp_bot.wait()
    p1_bot = jnp.dot(a_bot[...], h_prop, preferred_element_type=jnp.float32)
    p1 = jnp.concatenate([p1_top, p1_bot], axis=0)                             # P1

    # Per-hop class weights (coefficients already folded in on the host); each
    # row is a single cheap VMEM load.
    acc = h * mf_ref[pl.ds(0, 1), :] + p1 * mf_ref[pl.ds(1, 1), :]

    def prop(p_op):
        p_cast = p_op.astype(prop_dt)
        top = jnp.dot(a_top[...], p_cast, preferred_element_type=jnp.float32)
        bot = jnp.dot(a_bot[...], p_cast, preferred_element_type=jnp.float32)
        return jnp.concatenate([top, bot], axis=0)

    p_prev2, p_prev1 = h, p1
    if K <= 8:
        # Small K: static unroll (recommended regime).
        for i in range(2, K + 1):
            p = 2.0 * prop(p_prev1) - p_prev2
            acc = acc + p * mf_ref[pl.ds(i, 1), :]
            p_prev2, p_prev1 = p_prev1, p
    else:
        # Large K: bounded live ranges via fori_loop; per-hop weight row read
        # straight from the VMEM ref (no dynamic-slice on a vreg-held value).
        def body(i, carry):
            p2, p1c, acc_c = carry
            p = 2.0 * prop(p1c) - p2
            return (p1c, p, acc_c + p * mf_ref[pl.ds(i, 1), :])
        p_prev2, p_prev1, acc = lax.fori_loop(2, K + 1, body, (p_prev2, p_prev1, acc))

    # log_softmax over valid class lanes only; padded lanes excluded via -inf mask.
    lane = lax.broadcasted_iota(jnp.int32, acc.shape, 1)
    masked = jnp.where(lane < C, acc, jnp.float32(-jnp.inf))
    m = jnp.max(masked, axis=-1, keepdims=True)
    z = masked - m
    lse = jnp.log(jnp.sum(jnp.exp(z), axis=-1, keepdims=True))
    out_ref[...] = z - lse


def orthsgnn_forward(x, W, b, A_hat, lap_coefs, norm_weights, mf_weights, K,
                     prop_dtype=jnp.bfloat16):
    N, F = x.shape
    C = W.shape[1]

    # Fold every scalar coefficient into the per-hop class weights on the host.
    # coefs_trans(mode='none') is the identity; the forward only consumes lap_coefs[:K].
    coefs = jnp.concatenate(
        [1.0 / norm_weights[:1],
         lap_coefs[:K] / norm_weights[1:K + 1]]
    ).astype(jnp.float32)                                        # (K+1,)
    mf = mf_weights.reshape(K + 1, -1).astype(jnp.float32)
    if mf.shape[1] == 1:                                         # non-mulfilter broadcast
        mf = jnp.broadcast_to(mf, (K + 1, C))
    mf_scaled = coefs[:, None] * mf                              # (K+1, C)

    # Embedding hoisted out of the kernel (touched once; keeping x/W resident in
    # VMEM for the whole K-hop recursion wastes capacity).
    h = (jnp.dot(x.astype(jnp.float32), W.astype(jnp.float32),
                 precision=lax.Precision.HIGHEST)
         + b.reshape(1, C).astype(jnp.float32))                  # (N, C)

    # Lane / contraction padding: classes and nodes to multiples of 128.
    C_pad = _round_up(max(C, 1), 128)
    N_pad = _round_up(N, 128)
    half = N_pad // 2

    h_p = jnp.zeros((N_pad, C_pad), jnp.float32).at[:N, :C].set(h)
    A_p = jnp.zeros((N_pad, N_pad), prop_dtype).at[:N, :N].set(A_hat.astype(prop_dtype))
    A_top = A_p[:half]                                           # stays in HBM (pl.ANY)
    A_bot = A_p[half:]
    mf_p = jnp.zeros((K + 1, C_pad), jnp.float32).at[:, :C].set(mf_scaled)

    # Generation-aware VMEM budget for the resident-A design. No grid => no input
    # double-buffering, so ~1.3x of the true resident footprint is enough.
    prop_bytes = np.dtype(prop_dtype).itemsize
    nc_bytes = N_pad * C_pad * 4
    resident = (N_pad * N_pad * prop_bytes                 # A_hat scratch (two halves)
                + nc_bytes                                 # h input
                + nc_bytes                                 # output
                + 6 * nc_bytes                             # P carries / acc / half products
                + _round_up(K + 1, 8) * C_pad * 4)         # folded per-hop weights
    capacity = _vmem_capacity_bytes()
    budget = int(0.9 * capacity)
    if int(1.1 * resident) > budget:
        # TODO(synk): route to a streaming-A pipeline (A row-tiles from HBM,
        # [N,C] polynomial state resident) instead of raising.
        raise ValueError(
            f"resident-A OrthSGNN kernel needs ~{resident} bytes of VMEM but only "
            f"{budget} bytes are available on this TPU generation; streaming-A "
            f"fallback not implemented.")
    vmem_limit = min(max(int(1.3 * resident), 16 << 20), budget)

    kernel = functools.partial(orthsgnn_kernel, K=K, C=C)
    out_p = pl.pallas_call(
        kernel,
        out_shape=jax.ShapeDtypeStruct((N_pad, C_pad), jnp.float32),
        in_specs=[
            pl.BlockSpec(memory_space=pltpu.MemorySpace.VMEM),   # h (embedding)
            pl.BlockSpec(memory_space=pl.ANY),                   # A_hat top rows (HBM)
            pl.BlockSpec(memory_space=pl.ANY),                   # A_hat bottom rows (HBM)
            pl.BlockSpec(memory_space=pltpu.MemorySpace.VMEM),   # coef-folded mf weights
        ],
        out_specs=pl.BlockSpec(memory_space=pltpu.MemorySpace.VMEM),
        scratch_shapes=[
            pltpu.VMEM((half, N_pad), prop_dtype),               # A_hat top half
            pltpu.VMEM((half, N_pad), prop_dtype),               # A_hat bottom half
            pltpu.SemaphoreType.DMA((2,)),
        ],
        compiler_params=pltpu.CompilerParams(vmem_limit_bytes=vmem_limit),
    )(h_p, A_top, A_bot, mf_p)

    return out_p[:N, :C]


def reference_forward(x, W, b, A_hat, lap_coefs, norm_weights, mf_weights, K):
    hp = lax.Precision.HIGHEST
    h = jnp.dot(x, W, precision=hp) + b
    outs = [h, jnp.dot(A_hat, h, precision=hp)]
    for _ in range(2, K + 1):
        outs.append(2.0 * jnp.dot(A_hat, outs[-1], precision=hp) - outs[-2])
    coef_outs = [outs[0] / norm_weights[0]]
    for i in range(1, K + 1):
        coef_outs.append(lap_coefs[i - 1] / norm_weights[i] * outs[i])
    stacked = jnp.stack(coef_outs, axis=1)           # (N, K+1, C)
    ret = jnp.sum(stacked * mf_weights, axis=1)      # mulfilter_prop
    return jax.nn.log_softmax(ret, axis=-1)


def build_normalized_adjacency(key, N):
    """Dense D^-1/2 A D^-1/2 (symmetric ring + a few random undirected edges, no self loops)."""
    A = np.zeros((N, N), np.float32)
    for i in range(N):                                # ring
        A[i, (i + 1) % N] = 1.0
        A[(i + 1) % N, i] = 1.0
    extra = jax.random.randint(key, (8, 2), 0, N)
    for r, c in np.asarray(extra):
        if r != c:
            A[r, c] = 1.0
            A[c, r] = 1.0
    deg = A.sum(axis=0)                               # scatter_add over col targets
    dis = np.where(deg > 0, deg ** -0.5, 1.0)         # masked_fill(inf -> 1.0)
    A_hat = (dis[:, None] * A) * dis[None, :]
    return jnp.asarray(A_hat, jnp.float32)


if __name__ == "__main__":
    # Small synthetic config consistent with the module's __init__.
    N, F, C, K = 16, 8, 4, 4
    alpha = 2.0   # args.alpha -> lap_coefs init = min(1/alpha, 1.0) = 0.5

    key = jax.random.PRNGKey(0)
    kx, kw, kb, ka = jax.random.split(key, 4)

    x = jax.random.normal(kx, (N, F), jnp.float32)                      # data.x
    # nn.Linear(F, C) — deterministic uniform init
    bound = 1.0 / np.sqrt(F)
    W = jax.random.uniform(kw, (F, C), jnp.float32, -bound, bound)      # weight.T layout
    b = jax.random.uniform(kb, (1, C), jnp.float32, -bound, bound)

    A_hat = build_normalized_adjacency(ka, N)                           # my_gcn_norm (dense)

    lap_coefs = jnp.full((K + 1,), min(1.0 / alpha, 1.0), jnp.float32)  # nn.Parameter init
    norm_weights = jnp.ones((K + 1,), jnp.float32)
    mf_weights = jnp.ones((1, K + 1, C), jnp.float32)                   # args.mulfilter=True

    ref = reference_forward(x, W, b, A_hat, lap_coefs, norm_weights, mf_weights, K)

    # f32 propagation path: strict numeric check against the reference.
    out_f32 = orthsgnn_forward(x, W, b, A_hat, lap_coefs, norm_weights, mf_weights, K,
                               prop_dtype=jnp.float32)
    out_f32 = jax.block_until_ready(out_f32)
    np.testing.assert_allclose(np.asarray(out_f32), np.asarray(ref), rtol=1e-4, atol=1e-4)

    # Default path: bf16 A_hat / P MXU operands (carries / acc stay f32), so only a
    # loose check against the f32 reference.
    out_bf16 = orthsgnn_forward(x, W, b, A_hat, lap_coefs, norm_weights, mf_weights, K)
    out_bf16 = jax.block_until_ready(out_bf16)
    assert np.all(np.isfinite(np.asarray(out_bf16)))
    np.testing.assert_allclose(np.asarray(out_bf16), np.asarray(ref), rtol=0.0, atol=0.2)

    # K > 8 exercises the fori_loop path (dynamic per-hop weight-row reads).
    K2 = 10
    lap2 = jnp.full((K2 + 1,), min(1.0 / alpha, 1.0), jnp.float32)
    norm2 = jnp.ones((K2 + 1,), jnp.float32)
    mf2 = jnp.ones((1, K2 + 1, C), jnp.float32)
    ref2 = reference_forward(x, W, b, A_hat, lap2, norm2, mf2, K2)
    out2 = orthsgnn_forward(x, W, b, A_hat, lap2, norm2, mf2, K2, prop_dtype=jnp.float32)
    out2 = jax.block_until_ready(out2)
    np.testing.assert_allclose(np.asarray(out2), np.asarray(ref2), rtol=5e-4, atol=5e-4)

    print("KERNEL_OK")
</pallas_src>

<mosaic_0001>
module attributes {stable_mosaic.version = 11 : i64} {
  func.func @orthsgnn_kernel(%arg0: memref<128x128xf32, #tpu.memory_space<vmem>>, %arg1: memref<64x128xf32, #tpu.memory_space<any>>, %arg2: memref<64x128xf32, #tpu.memory_space<any>>, %arg3: memref<5x128xf32, #tpu.memory_space<vmem>>, %arg4: memref<128x128xf32, #tpu.memory_space<vmem>>, %arg5: memref<64x128xf32, #tpu.memory_space<vmem>>, %arg6: memref<64x128xf32, #tpu.memory_space<vmem>>, %arg7: memref<2x!tpu.dma_semaphore, #tpu.memory_space<semaphore_mem>>) attributes {dimension_semantics = [], scalar_prefetch = 0 : i64, scratch_operands = 3 : i64, tpu.core_type = #tpu.core_type<tc>} {
    %c0_i32 = arith.constant 0 : i32
    %0 = tpu.memref_slice %arg7[%c0_i32] : memref<2x!tpu.dma_semaphore, #tpu.memory_space<semaphore_mem>> -> memref<1x!tpu.dma_semaphore, #tpu.memory_space<semaphore_mem>>
    %1 = tpu.memref_squeeze %0 : memref<1x!tpu.dma_semaphore, #tpu.memory_space<semaphore_mem>> -> memref<!tpu.dma_semaphore, #tpu.memory_space<semaphore_mem>>
    tpu.enqueue_dma source(%arg1 : memref<64x128xf32, #tpu.memory_space<any>>) target(%arg5 : memref<64x128xf32, #tpu.memory_space<vmem>>) target_semaphore(%1 : memref<!tpu.dma_semaphore, #tpu.memory_space<semaphore_mem>>)
    %c1_i32 = arith.constant 1 : i32
    %2 = tpu.memref_slice %arg7[%c1_i32] : memref<2x!tpu.dma_semaphore, #tpu.memory_space<semaphore_mem>> -> memref<1x!tpu.dma_semaphore, #tpu.memory_space<semaphore_mem>>
    %3 = tpu.memref_squeeze %2 : memref<1x!tpu.dma_semaphore, #tpu.memory_space<semaphore_mem>> -> memref<!tpu.dma_semaphore, #tpu.memory_space<semaphore_mem>>
    tpu.enqueue_dma source(%arg2 : memref<64x128xf32, #tpu.memory_space<any>>) target(%arg6 : memref<64x128xf32, #tpu.memory_space<vmem>>) target_semaphore(%3 : memref<!tpu.dma_semaphore, #tpu.memory_space<semaphore_mem>>)
    %c0 = arith.constant 0 : index
    %c0_0 = arith.constant 0 : index
    %4 = vector.load %arg0[%c0, %c0_0] : memref<128x128xf32, #tpu.memory_space<vmem>>, vector<128x128xf32>
    %c0_i32_1 = arith.constant 0 : i32
    %5 = tpu.memref_slice %arg7[%c0_i32_1] : memref<2x!tpu.dma_semaphore, #tpu.memory_space<semaphore_mem>> -> memref<1x!tpu.dma_semaphore, #tpu.memory_space<semaphore_mem>>
    %6 = tpu.memref_squeeze %5 : memref<1x!tpu.dma_semaphore, #tpu.memory_space<semaphore_mem>> -> memref<!tpu.dma_semaphore, #tpu.memory_space<semaphore_mem>>
    tpu.wait_dma2 semaphore(%6 : memref<!tpu.dma_semaphore, #tpu.memory_space<semaphore_mem>>) src(%arg1 : memref<64x128xf32, #tpu.memory_space<any>>) dst(%arg5 : memref<64x128xf32, #tpu.memory_space<vmem>>)
    %c0_2 = arith.constant 0 : index
    %c0_3 = arith.constant 0 : index
    %7 = vector.load %arg5[%c0_2, %c0_3] : memref<64x128xf32, #tpu.memory_space<vmem>>, vector<64x128xf32>
    %cst = arith.constant dense<0.000000e+00> : vector<64x128xf32>
    %8 = tpu.matmul %7, %4, %cst {dimension_numbers = #tpu.dot_dimension_numbers<[1], [0], [0], [1], [0, 0, 1, 1], [], []>} : vector<64x128xf32>, vector<128x128xf32>, vector<64x128xf32> -> vector<64x128xf32>
    %c1_i32_4 = arith.constant 1 : i32
    %9 = tpu.memref_slice %arg7[%c1_i32_4] : memref<2x!tpu.dma_semaphore, #tpu.memory_space<semaphore_mem>> -> memref<1x!tpu.dma_semaphore, #tpu.memory_space<semaphore_mem>>
    %10 = tpu.memref_squeeze %9 : memref<1x!tpu.dma_semaphore, #tpu.memory_space<semaphore_mem>> -> memref<!tpu.dma_semaphore, #tpu.memory_space<semaphore_mem>>
    tpu.wait_dma2 semaphore(%10 : memref<!tpu.dma_semaphore, #tpu.memory_space<semaphore_mem>>) src(%arg2 : memref<64x128xf32, #tpu.memory_space<any>>) dst(%arg6 : memref<64x128xf32, #tpu.memory_space<vmem>>)
    %c0_5 = arith.constant 0 : index
    %c0_6 = arith.constant 0 : index
    %11 = vector.load %arg6[%c0_5, %c0_6] : memref<64x128xf32, #tpu.memory_space<vmem>>, vector<64x128xf32>
    %cst_7 = arith.constant dense<0.000000e+00> : vector<64x128xf32>
    %12 = tpu.matmul %11, %4, %cst_7 {dimension_numbers = #tpu.dot_dimension_numbers<[1], [0], [0], [1], [0, 0, 1, 1], [], []>} : vector<64x128xf32>, vector<128x128xf32>, vector<64x128xf32> -> vector<64x128xf32>
    %13 = tpu.concatenate %8, %12 in 0 : vector<64x128xf32>, vector<64x128xf32> -> vector<128x128xf32>
    %c0_8 = arith.constant 0 : index
    %c0_9 = arith.constant 0 : index
    %14 = vector.load %arg3[%c0_8, %c0_9] : memref<5x128xf32, #tpu.memory_space<vmem>>, vector<1x128xf32>
    %15 = vector.broadcast %14 : vector<1x128xf32> to vector<128x128xf32>
    %16 = arith.mulf %4, %15 : vector<128x128xf32>
    %c1 = arith.constant 1 : index
    %c0_10 = arith.constant 0 : index
    %17 = vector.load %arg3[%c1, %c0_10] : memref<5x128xf32, #tpu.memory_space<vmem>>, vector<1x128xf32>
    %18 = vector.broadcast %17 : vector<1x128xf32> to vector<128x128xf32>
    %19 = arith.mulf %13, %18 : vector<128x128xf32>
    %20 = arith.addf %16, %19 : vector<128x128xf32>
    %c0_11 = arith.constant 0 : index
    %c0_12 = arith.constant 0 : index
    %21 = vector.load %arg5[%c0_11, %c0_12] : memref<64x128xf32, #tpu.memory_space<vmem>>, vector<64x128xf32>
    %cst_13 = arith.constant dense<0.000000e+00> : vector<64x128xf32>
    %22 = tpu.matmul %21, %13, %cst_13 {dimension_numbers = #tpu.dot_dimension_numbers<[1], [0], [0], [1], [0, 0, 1, 1], [], []>} : vector<64x128xf32>, vector<128x128xf32>, vector<64x128xf32> -> vector<64x128xf32>
    %c0_14 = arith.constant 0 : index
    %c0_15 = arith.constant 0 : index
    %23 = vector.load %arg6[%c0_14, %c0_15] : memref<64x128xf32, #tpu.memory_space<vmem>>, vector<64x128xf32>
    %cst_16 = arith.constant dense<0.000000e+00> : vector<64x128xf32>
    %24 = tpu.matmul %23, %13, %cst_16 {dimension_numbers = #tpu.dot_dimension_numbers<[1], [0], [0], [1], [0, 0, 1, 1], [], []>} : vector<64x128xf32>, vector<128x128xf32>, vector<64x128xf32> -> vector<64x128xf32>
    %25 = tpu.concatenate %22, %24 in 0 : vector<64x128xf32>, vector<64x128xf32> -> vector<128x128xf32>
    %cst_17 = arith.constant 2.000000e+00 : f32
    %26 = vector.broadcast %cst_17 : f32 to vector<128x128xf32>
    %27 = arith.mulf %26, %25 : vector<128x128xf32>
    %28 = arith.subf %27, %4 : vector<128x128xf32>
    %c2 = arith.constant 2 : index
    %c0_18 = arith.constant 0 : index
    %29 = vector.load %arg3[%c2, %c0_18] : memref<5x128xf32, #tpu.memory_space<vmem>>, vector<1x128xf32>
    %30 = vector.broadcast %29 : vector<1x128xf32> to vector<128x128xf32>
    %31 = arith.mulf %28, %30 : vector<128x128xf32>
    %32 = arith.addf %20, %31 : vector<128x128xf32>
    %c0_19 = arith.constant 0 : index
    %c0_20 = arith.constant 0 : index
    %33 = vector.load %arg5[%c0_19, %c0_20] : memref<64x128xf32, #tpu.memory_space<vmem>>, vector<64x128xf32>
    %cst_21 = arith.constant dense<0.000000e+00> : vector<64x128xf32>
    %34 = tpu.matmul %33, %28, %cst_21 {dimension_numbers = #tpu.dot_dimension_numbers<[1], [0], [0], [1], [0, 0, 1, 1], [], []>} : vector<64x128xf32>, vector<128x128xf32>, vector<64x128xf32> -> vector<64x128xf32>
    %c0_22 = arith.constant 0 : index
    %c0_23 = arith.constant 0 : index
    %35 = vector.load %arg6[%c0_22, %c0_23] : memref<64x128xf32, #tpu.memory_space<vmem>>, vector<64x128xf32>
    %cst_24 = arith.constant dense<0.000000e+00> : vector<64x128xf32>
    %36 = tpu.matmul %35, %28, %cst_24 {dimension_numbers = #tpu.dot_dimension_numbers<[1], [0], [0], [1], [0, 0, 1, 1], [], []>} : vector<64x128xf32>, vector<128x128xf32>, vector<64x128xf32> -> vector<64x128xf32>
    %37 = tpu.concatenate %34, %36 in 0 : vector<64x128xf32>, vector<64x128xf32> -> vector<128x128xf32>
    %cst_25 = arith.constant 2.000000e+00 : f32
    %38 = vector.broadcast %cst_25 : f32 to vector<128x128xf32>
    %39 = arith.mulf %38, %37 : vector<128x128xf32>
    %40 = arith.subf %39, %13 : vector<128x128xf32>
    %c3 = arith.constant 3 : index
    %c0_26 = arith.constant 0 : index
    %41 = vector.load %arg3[%c3, %c0_26] : memref<5x128xf32, #tpu.memory_space<vmem>>, vector<1x128xf32>
    %42 = vector.broadcast %41 : vector<1x128xf32> to vector<128x128xf32>
    %43 = arith.mulf %40, %42 : vector<128x128xf32>
    %44 = arith.addf %32, %43 : vector<128x128xf32>
    %c0_27 = arith.constant 0 : index
    %c0_28 = arith.constant 0 : index
    %45 = vector.load %arg5[%c0_27, %c0_28] : memref<64x128xf32, #tpu.memory_space<vmem>>, vector<64x128xf32>
    %cst_29 = arith.constant dense<0.000000e+00> : vector<64x128xf32>
    %46 = tpu.matmul %45, %40, %cst_29 {dimension_numbers = #tpu.dot_dimension_numbers<[1], [0], [0], [1], [0, 0, 1, 1], [], []>} : vector<64x128xf32>, vector<128x128xf32>, vector<64x128xf32> -> vector<64x128xf32>
    %c0_30 = arith.constant 0 : index
    %c0_31 = arith.constant 0 : index
    %47 = vector.load %arg6[%c0_30, %c0_31] : memref<64x128xf32, #tpu.memory_space<vmem>>, vector<64x128xf32>
    %cst_32 = arith.constant dense<0.000000e+00> : vector<64x128xf32>
    %48 = tpu.matmul %47, %40, %cst_32 {dimension_numbers = #tpu.dot_dimension_numbers<[1], [0], [0], [1], [0, 0, 1, 1], [], []>} : vector<64x128xf32>, vector<128x128xf32>, vector<64x128xf32> -> vector<64x128xf32>
    %49 = tpu.concatenate %46, %48 in 0 : vector<64x128xf32>, vector<64x128xf32> -> vector<128x128xf32>
    %cst_33 = arith.constant 2.000000e+00 : f32
    %50 = vector.broadcast %cst_33 : f32 to vector<128x128xf32>
    %51 = arith.mulf %50, %49 : vector<128x128xf32>
    %52 = arith.subf %51, %28 : vector<128x128xf32>
    %c4 = arith.constant 4 : index
    %c0_34 = arith.constant 0 : index
    %53 = vector.load %arg3[%c4, %c0_34] : memref<5x128xf32, #tpu.memory_space<vmem>>, vector<1x128xf32>
    %54 = vector.broadcast %53 : vector<1x128xf32> to vector<128x128xf32>
    %55 = arith.mulf %52, %54 : vector<128x128xf32>
    %56 = arith.addf %44, %55 : vector<128x128xf32>
    %57 = tpu.iota {dimensions = array<i32: 1>} : vector<128x128xi32>
    %c4_i32 = arith.constant 4 : i32
    %58 = vector.broadcast %c4_i32 : i32 to vector<128x128xi32>
    %59 = arith.cmpi slt, %57, %58 : vector<128x128xi32>
    %cst_35 = arith.constant 0xFF800000 : f32
    %60 = vector.broadcast %cst_35 : f32 to vector<128x128xf32>
    %61 = arith.select %59, %56, %60 : vector<128x128xi1>, vector<128x128xf32>
    %cst_36 = arith.constant dense<0xFF800000> : vector<128xf32>
    %62 = vector.multi_reduction <maximumf>, %61, %cst_36 [1] : vector<128x128xf32> to vector<128xf32>
    %63 = vector.shape_cast %62 : vector<128xf32> to vector<128x1xf32>
    %64 = vector.broadcast %63 : vector<128x1xf32> to vector<128x128xf32>
    %65 = arith.subf %61, %64 : vector<128x128xf32>
    %66 = math.exp %65 : vector<128x128xf32>
    %cst_37 = arith.constant dense<0.000000e+00> : vector<128xf32>
    %67 = vector.multi_reduction <add>, %66, %cst_37 [1] : vector<128x128xf32> to vector<128xf32>
    %68 = vector.shape_cast %67 : vector<128xf32> to vector<128x1xf32>
    %69 = math.log %68 : vector<128x1xf32>
    %70 = vector.broadcast %69 : vector<128x1xf32> to vector<128x128xf32>
    %71 = arith.subf %65, %70 : vector<128x128xf32>
    %c0_38 = arith.constant 0 : index
    %c0_39 = arith.constant 0 : index
    %72 = vector.load %arg4[%c0_38, %c0_39] : memref<128x128xf32, #tpu.memory_space<vmem>>, vector<128x128xf32>
    tpu.vector_store %arg4[%c0_38, %c0_39], %71 {strides = array<i32>} : memref<128x128xf32, #tpu.memory_space<vmem>>, vector<128x128xf32>,
    return
  }
}

</mosaic_0001>

<bundles_post_ra>
// kernel: tpu_custom_call.1
= control target key start
LH: loop header
LB: loop body
LE: loop exit
PB: predicated region body
PF: predicated region fallthrough
CT: control target
= control target key end

     0   :  { %9 = vsyncpa [#allocation6], 0  ;;  %s3086_s0 = inlined_call_operand.hbm [shape: f32[128,128], index: 0, kind: input, shape index: {}]   ;;  %s3087_s1 = inlined_call_operand.hbm [shape: f32[64,128], index: 1, kind: input, shape index: {}]   ;;  %s3088_s2 = inlined_call_operand.hbm [shape: f32[64,128], index: 2, kind: input, shape index: {}]   ;;  %s3089_s3 = inlined_call_operand.hbm [shape: f32[5,128], index: 3, kind: input, shape index: {}]   ;;  %s3090_s4 = inlined_call_operand.hbm [shape: f32[128,128], index: 4, kind: output, shape index: {}]  }
   0x1   :  { %10 = vsyncpa [#allocation9], 0 }
   0x2   :  { %11 = vsyncpa [#allocation7], 0  ;;  %s2171_s15 = smov [#allocation5]  }
   0x3   :  { %s17_s16 = sshll.u32 %s2171_s15, 4  ;;  %s18_s16 = int_to_ptr.vmem [resolvable:$true] %s17_s16 }
   0x4   :  { %s2069_s17 = scalar_lea.vmem %s18_s16, 2048  ;;  %p2074_p1 = scmp.lt.s32.totalorder %s18_s16, %s18_s16 }
   0x5   :  { %p2070_p0 = scmp.ne.s32.totalorder %s18_s16, %s2069_s17  ;;  %p2075_p2 = scmp.lt.s32.totalorder %s2069_s17, %s2069_s17 }
   0x7   :  { %p2076_p3 = por %p2075_p2, %p2074_p1 }
   0x9   :  { %p2077_p4 = pnand %p2076_p3, %p2070_p0 }
   0xb   :  { %2080 = shalt.err (!%p2077_p4)
}
   0xc   :  { %s2172_s18 = smov 128   ;;  %s2173_s19 = smov 8  }
   0xd   :  { %23 = dma.hbm_to_vmem [thread:$0]  %s3086_s0, 2048, %s18_s16, [#allocation6], %s2172_s18, %s2172_s18, %s2173_s19  }
   0xe   :  { %s2174_s22 = smov [#allocation8]  }
   0xf   :  { %s30_s23 = sshll.u32 %s2174_s22, 4  ;;  %s31_s23 = int_to_ptr.vmem [resolvable:$true] %s30_s23 }
  0x10   :  { %s2089_s24 = scalar_lea.vmem %s31_s23, 128  ;;  %p2094_p6 = scmp.lt.s32.totalorder %s31_s23, %s31_s23 }
  0x11   :  { %p2090_p5 = scmp.ne.s32.totalorder %s31_s23, %s2089_s24  ;;  %p2095_p7 = scmp.lt.s32.totalorder %s2089_s24, %s2089_s24 }
  0x13   :  { %p2096_p8 = por %p2095_p7, %p2094_p6 }
  0x15   :  { %p2097_p9 = pnand %p2096_p8, %p2090_p5 }
  0x17   :  { %2100 = shalt.err (!%p2097_p9)
}
  0x18   :  { %33 = dma.hbm_to_vmem [thread:$0]  %s3089_s3, 128, %s31_s23, [#allocation9]  }
  0x19   :  { %2161 = dma.done.wait [#allocation6], 2048  }
  0x1a   :  { %2162 = vsyncadd [#allocation6], 4294965248 }
  0x1b   :  { %2163 = dma.done.wait [#allocation9], 128  }
  0x1c   :  { %2164 = vsyncadd [#allocation9], 4294967168  ;;  %s2175_s27 = smov [#allocation2]   ;;  %s2176_s28 = smov [#allocation3]  }
  0x1d   :  { %s47_s0 = sshll.u32 %s2175_s27, 4  ;;  %s59_s29 = sshll.u32 %s2176_s28, 4  ;;  %s48_s0 = int_to_ptr.vmem [resolvable:$true] %s47_s0  ;;  %s60_s29 = int_to_ptr.vmem [resolvable:$true] %s59_s29 }
  0x1e   :  { %s2109_s30 = scalar_lea.vmem %s48_s0, 1024  ;;  %p2114_p11 = scmp.lt.s32.totalorder %s48_s0, %s48_s0 }
  0x1f   :  { %p2110_p10 = scmp.ne.s32.totalorder %s48_s0, %s2109_s30  ;;  %p2115_p12 = scmp.lt.s32.totalorder %s2109_s30, %s2109_s30 }
  0x21   :  { %p2116_p13 = por %p2115_p12, %p2114_p11 }
  0x23   :  { %p2117_p0 = pnand %p2116_p13, %p2110_p10 }
  0x25   :  { %2120 = shalt.err (!%p2117_p0)  }
  0x26   :  { %50 = dma.hbm_to_vmem [thread:$0]  %s3087_s1, 1024, %s48_s0, [#allocation4] }
  0x27   :  { %s2129_s3 = scalar_lea.vmem %s60_s29, 1024  ;;  %p2134_p2 = scmp.lt.s32.totalorder %s60_s29, %s60_s29 }
  0x28   :  { %p2130_p1 = scmp.ne.s32.totalorder %s60_s29, %s2129_s3  ;;  %p2135_p3 = scmp.lt.s32.totalorder %s2129_s3, %s2129_s3 }
  0x2a   :  { %p2136_p4 = por %p2135_p3, %p2134_p2 }
  0x2c   :  { %p2137_p5 = pnand %p2136_p4, %p2130_p1 }
  0x2e   :  { %2140 = shalt.err (!%p2137_p5)  }
  0x2f   :  { %62 = dma.hbm_to_vmem [thread:$0]  %s3088_s2, 1024, %s60_s29, [#allocation4 + $0x1]  ;;  %v2218_v0 = vld [vmem:[#allocation5] sm:$0xff]  ;;  %v2220_v1 = vld [vmem:[#allocation5 + $0x8] sm:$0xff]  ;;  %v2222_v2 = vld [vmem:[#allocation5 + $0x10] sm:$0xff] }
  0x30   :  { %v2224_v3 = vld [vmem:[#allocation5 + $0x18] sm:$0xff]  ;;  %v2226_v4 = vld [vmem:[#allocation5 + $0x20] sm:$0xff]  ;;  %v2228_v5 = vld [vmem:[#allocation5 + $0x28] sm:$0xff] }
  0x31   :  { %v2230_v6 = vld [vmem:[#allocation5 + $0x30] sm:$0xff]  ;;  %v2232_v7 = vld [vmem:[#allocation5 + $0x38] sm:$0xff]  ;;  %v2234_v8 = vld [vmem:[#allocation5 + $0x40] sm:$0xff] }
  0x32   :  { %v2236_v9 = vld [vmem:[#allocation5 + $0x48] sm:$0xff]  ;;  %v2238_v10 = vld [vmem:[#allocation5 + $0x50] sm:$0xff]  ;;  %v2240_v11 = vld [vmem:[#allocation5 + $0x58] sm:$0xff] }
  0x33   :  { %v2242_v12 = vld [vmem:[#allocation5 + $0x60] sm:$0xff]  ;;  %v2244_v13 = vld [vmem:[#allocation5 + $0x68] sm:$0xff]  ;;  %v2246_v14 = vld [vmem:[#allocation5 + $0x70] sm:$0xff] }
  0x34   :  { %v2248_v15 = vld [vmem:[#allocation5 + $0x78] sm:$0xff] }
  0x35   :  { %1638 = vmatprep.subr.mxu0 %v2248_v15 }
  0x36   :  { %2165 = dma.done.wait [#allocation4], 1024 }
  0x37   :  { %2166 = vsyncadd [#allocation4], 4294966272  ;;  %1639 = vmatpush3.msra.mxu0 %v2248_v15  ;;  %v82_v16 = vld [vmem:[#allocation2] sm:$0xff]  ;;  %v83_v17 = vld [vmem:[#allocation2 + $0x8] sm:$0xff]  ;;  %1682 = vmatprep.subr.mxu1 %v2248_v15 }
  0x38   :  { %1640 = vmatprep.subr.mxu0 %v2246_v14  ;;  %1670 = vmatprep.mubr.f32.mxu0 %v82_v16  ;;  %v84_v18 = vld [vmem:[#allocation2 + $0x10] sm:$0xff]  ;;  %v85_v19 = vld [vmem:[#allocation2 + $0x18] sm:$0xff]  ;;  %v86_v20 = vld [vmem:[#allocation2 + $0x20] sm:$0xff] }
  0x39   :  { %1641 = vmatpush3.msra.mxu0 %v2246_v14  ;;  %v87_v21 = vld [vmem:[#allocation2 + $0x28] sm:$0xff]  ;;  %v88_v22 = vld [vmem:[#allocation2 + $0x30] sm:$0xff]  ;;  %v89_v23 = vld [vmem:[#allocation2 + $0x38] sm:$0xff] }
  0x3a   :  { %1642 = vmatprep.subr.mxu0 %v2244_v13 }
  0x3b   :  { %1643 = vmatpush3.msra.mxu0 %v2244_v13 }
  0x3c   :  { %1644 = vmatprep.subr.mxu0 %v2242_v12 }
  0x3d   :  { %1645 = vmatpush3.msra.mxu0 %v2242_v12 }
  0x3e   :  { %1646 = vmatprep.subr.mxu0 %v2240_v11 }
  0x3f   :  { %1647 = vmatpush3.msra.mxu0 %v2240_v11 }
  0x40   :  { %1648 = vmatprep.subr.mxu0 %v2238_v10 }
  0x41   :  { %1649 = vmatpush3.msra.mxu0 %v2238_v10 }
  0x42   :  { %1650 = vmatprep.subr.mxu0 %v2236_v9 }
  0x43   :  { %1651 = vmatpush3.msra.mxu0 %v2236_v9 }
  0x44   :  { %1652 = vmatprep.subr.mxu0 %v2234_v8 }
  0x45   :  { %1653 = vmatpush3.msra.mxu0 %v2234_v8 }
  0x46   :  { %1654 = vmatprep.subr.mxu0 %v2232_v7 }
  0x47   :  { %1655 = vmatpush3.msra.mxu0 %v2232_v7 }
  0x48   :  { %1656 = vmatprep.subr.mxu0 %v2230_v6 }
  0x49   :  { %1657 = vmatpush3.msra.mxu0 %v2230_v6 }
  0x4a   :  { %1658 = vmatprep.subr.mxu0 %v2228_v5 }
  0x4b   :  { %1659 = vmatpush3.msra.mxu0 %v2228_v5 }
  0x4c   :  { %1660 = vmatprep.subr.mxu0 %v2226_v4 }
  0x4d   :  { %1661 = vmatpush3.msra.mxu0 %v2226_v4 }
  0x4e   :  { %1662 = vmatprep.subr.mxu0 %v2224_v3 }
  0x4f   :  { %1663 = vmatpush3.msra.mxu0 %v2224_v3 }
  0x50   :  { %1664 = vmatprep.subr.mxu0 %v2222_v2 }
  0x51   :  { %1665 = vmatpush3.msra.mxu0 %v2222_v2 }
  0x52   :  { %1666 = vmatprep.subr.mxu0 %v2220_v1 }
  0x53   :  { %1667 = vmatpush3.msra.mxu0 %v2220_v1 }
  0x54   :  { %1668 = vmatprep.subr.mxu0 %v2218_v0 }
  0x55   :  { %1669 = vmatpush3.msra.mxu0 %v2218_v0 }
  0x56   :  { %1671 = vmatmul.mubr.f32.vlgmr.msra.gmra.mxu0 %v83_v17 }
  0x57   :  { %1673 = vmatprep.mubr.f32.mxu0 %v84_v18 }
  0x5a   :  { %1674 = vmatmul.mubr.f32.gmra.mxu0 %v85_v19 }
  0x5b   :  { %1676 = vmatprep.mubr.f32.mxu0 %v86_v20 }
  0x5e   :  { %1677 = vmatmul.mubr.f32.gmra.mxu0 %v87_v21 }
  0x5f   :  { %1679 = vmatprep.mubr.f32.mxu0 %v88_v22 }
  0x62   :  { %1680 = vmatmul.mubr.f32.gmra.mxu0 %v89_v23 }
 0x116   :  { %v2282_v24 = vpop.f32.mrf.mxu0 }
 0x117   :  { %3130 = vst [vmem:[#allocation22_spill] sm:$0xff] %v2282_v24 }
 0x118   :  { %v2284_v25 = vpop.f32.mrf.mxu0 }
 0x119   :  { %3131 = vst [vmem:[#allocation23_spill] sm:$0xff] %v2284_v25 }
 0x11a   :  { %v2286_v26 = vpop.f32.mrf.mxu0 }
 0x11b   :  { %3132 = vst [vmem:[#allocation24_spill] sm:$0xff] %v2286_v26 }
 0x11c   :  { %v2288_v27 = vpop.f32.mrf.mxu0 }
 0x11d   :  { %3133 = vst [vmem:[#allocation25_spill] sm:$0xff] %v2288_v27 }
 0x11e   :  { %v2290_v28 = vpop.f32.mrf.mxu0 }
 0x120   :  { %v2292_v29 = vpop.f32.mrf.mxu0 }
 0x122   :  { %v2294_v30 = vpop.f32.mrf.mxu0 }
 0x124   :  { %v2296_v31 = vpop.f32.mrf.mxu0 }
 0x125   :  { %2167 = dma.done.wait [#allocation4 + $0x1], 1024 }
 0x126   :  { %2168 = vsyncadd [#allocation4 + $0x1], 4294966272  ;;  %1683 = vmatpush3.msra.mxu1 %v2248_v15  ;;  %v2306_v32 = vld [vmem:[#allocation3] sm:$0xff]  ;;  %v2331_v33 = vld [vmem:[#allocation3 + $0x8] sm:$0xff]  ;;  %s2177_s1 = smov [#allocation10]  }
 0x127   :  { %1684 = vmatprep.subr.mxu1 %v2246_v14  ;;  %1714 = vmatprep.mubr.f32.mxu1 %v2306_v32  ;;  %v2334_v34 = vld [vmem:[#allocation3 + $0x10] sm:$0xff]  ;;  %v2339_v35 = vld [vmem:[#allocation3 + $0x18] sm:$0xff]  ;;  %v2341_v36 = vld [vmem:[#allocation3 + $0x20] sm:$0xff]  ;;  %s1413_s2 = sshll.u32 %s2177_s1, 4  ;;  %s1414_s2 = int_to_ptr.vmem [resolvable:$true] %s1413_s2 }
 0x128   :  { %1685 = vmatpush3.msra.mxu1 %v2246_v14  ;;  %v2345_v37 = vld [vmem:[#allocation3 + $0x28] sm:$0xff]  ;;  %v2347_v38 = vld [vmem:[#allocation3 + $0x30] sm:$0xff]  ;;  %v2351_v39 = vld [vmem:[#allocation3 + $0x38] sm:$0xff]  ;;  %s2141_s9 = scalar_lea.vmem %s1414_s2, 2048  ;;  %p2146_p7 = scmp.lt.s32.totalorder %s1414_s2, %s1414_s2 }
 0x129   :  { %1686 = vmatprep.subr.mxu1 %v2244_v13  ;;  %v2355_v40 = vld [vmem:[#allocation2] sm:$0xff]  ;;  %v2434_v49 = vld [vmem:[#allocation2 + $0x8] sm:$0xff]  ;;  %v2438_v50 = vld [vmem:[#allocation2 + $0x10] sm:$0xff]  ;;  %p2142_p6 = scmp.ne.s32.totalorder %s1414_s2, %s2141_s9  ;;  %p2147_p8 = scmp.lt.s32.totalorder %s2141_s9, %s2141_s9 }
 0x12a   :  { %1687 = vmatpush3.msra.mxu1 %v2244_v13  ;;  %1758 = vmatprep.mubr.f32.mxu0 %v2355_v40  ;;  %v2446_v51 = vld [vmem:[#allocation2 + $0x18] sm:$0xff]  ;;  %v2448_v52 = vld [vmem:[#allocation2 + $0x20] sm:$0xff]  ;;  %v2454_v53 = vld [vmem:[#allocation2 + $0x28] sm:$0xff] }
 0x12b   :  { %1688 = vmatprep.subr.mxu1 %v2242_v12  ;;  %v2456_v54 = vld [vmem:[#allocation2 + $0x30] sm:$0xff]  ;;  %v2462_v55 = vld [vmem:[#allocation2 + $0x38] sm:$0xff]  ;;  %p2148_p9 = por %p2147_p8, %p2146_p7 }
 0x12c   :  { %1689 = vmatpush3.msra.mxu1 %v2242_v12 }
 0x12d   :  { %1690 = vmatprep.subr.mxu1 %v2240_v11  ;;  %p2149_p10 = pnand %p2148_p9, %p2142_p6 }
 0x12e   :  { %1691 = vmatpush3.msra.mxu1 %v2240_v11 }
 0x12f   :  { %1692 = vmatprep.subr.mxu1 %v2238_v10 }
 0x130   :  { %1693 = vmatpush3.msra.mxu1 %v2238_v10 }
 0x131   :  { %1694 = vmatprep.subr.mxu1 %v2236_v9 }
 0x132   :  { %1695 = vmatpush3.msra.mxu1 %v2236_v9 }
 0x133   :  { %1696 = vmatprep.subr.mxu1 %v2234_v8 }
 0x134   :  { %1697 = vmatpush3.msra.mxu1 %v2234_v8 }
 0x135   :  { %1698 = vmatprep.subr.mxu1 %v2232_v7 }
 0x136   :  { %1699 = vmatpush3.msra.mxu1 %v2232_v7 }
 0x137   :  { %1700 = vmatprep.subr.mxu1 %v2230_v6 }
 0x138   :  { %1701 = vmatpush3.msra.mxu1 %v2230_v6 }
 0x139   :  { %1702 = vmatprep.subr.mxu1 %v2228_v5 }
 0x13a   :  { %1703 = vmatpush3.msra.mxu1 %v2228_v5 }
 0x13b   :  { %1704 = vmatprep.subr.mxu1 %v2226_v4 }
 0x13c   :  { %1705 = vmatpush3.msra.mxu1 %v2226_v4 }
 0x13d   :  { %1706 = vmatprep.subr.mxu1 %v2224_v3 }
 0x13e   :  { %1707 = vmatpush3.msra.mxu1 %v2224_v3 }
 0x13f   :  { %1708 = vmatprep.subr.mxu1 %v2222_v2 }
 0x140   :  { %1709 = vmatpush3.msra.mxu1 %v2222_v2 }
 0x141   :  { %1710 = vmatprep.subr.mxu1 %v2220_v1 }
 0x142   :  { %1711 = vmatpush3.msra.mxu1 %v2220_v1 }
 0x143   :  { %1712 = vmatprep.subr.mxu1 %v2218_v0 }
 0x144   :  { %1713 = vmatpush3.msra.mxu1 %v2218_v0 }
 0x145   :  { %1715 = vmatmul.mubr.f32.vlgmr.msra.gmra.mxu1 %v2331_v33 }
 0x146   :  { %1717 = vmatprep.mubr.f32.mxu1 %v2334_v34 }
 0x149   :  { %1718 = vmatmul.mubr.f32.gmra.mxu1 %v2339_v35 }
 0x14a   :  { %1720 = vmatprep.mubr.f32.mxu1 %v2341_v36 }
 0x14d   :  { %1721 = vmatmul.mubr.f32.gmra.mxu1 %v2345_v37 }
 0x14e   :  { %1723 = vmatprep.mubr.f32.mxu1 %v2347_v38 }
 0x151   :  { %1724 = vmatmul.mubr.f32.gmra.mxu1 %v2351_v39 }
 0x152   :  { %1802 = vmatprep.mubr.f32.mxu1 %v2306_v32 }
 0x205   :  { %v2358_v41 = vpop.f32.mrf.mxu1 }
 0x207   :  { %v2360_v42 = vpop.f32.mrf.mxu1 }
 0x209   :  { %v2362_v43 = vpop.f32.mrf.mxu1 }
 0x20b   :  { %v2364_v44 = vpop.f32.mrf.mxu1 }
 0x20d   :  { %v2366_v45 = vpop.f32.mrf.mxu1 }
 0x20f   :  { %v2368_v46 = vpop.f32.mrf.mxu1 }
 0x211   :  { %v2370_v47 = vpop.f32.mrf.mxu1 }
 0x212   :  { %1726 = vmatprep.subr.mxu0 %v2370_v47  ;;  %1770 = vmatprep.subr.mxu1 %v2370_v47 }
 0x213   :  { %v2374_v48 = vpop.f32.mrf.mxu1  ;;  %1727 = vmatpush3.msra.mxu0 %v2370_v47  ;;  %1771 = vmatpush3.msra.mxu1 %v2370_v47 }
 0x214   :  { %1728 = vmatprep.subr.mxu0 %v2374_v48  ;;  %1772 = vmatprep.subr.mxu1 %v2374_v48 }
 0x215   :  { %1729 = vmatpush3.msra.mxu0 %v2374_v48  ;;  %1773 = vmatpush3.msra.mxu1 %v2374_v48 }
 0x216   :  { %1730 = vmatprep.subr.mxu0 %v2366_v45  ;;  %1774 = vmatprep.subr.mxu1 %v2366_v45 }
 0x217   :  { %1731 = vmatpush3.msra.mxu0 %v2366_v45  ;;  %1775 = vmatpush3.msra.mxu1 %v2366_v45 }
 0x218   :  { %1732 = vmatprep.subr.mxu0 %v2368_v46  ;;  %1776 = vmatprep.subr.mxu1 %v2368_v46 }
 0x219   :  { %1733 = vmatpush3.msra.mxu0 %v2368_v46  ;;  %1777 = vmatpush3.msra.mxu1 %v2368_v46 }
 0x21a   :  { %1734 = vmatprep.subr.mxu0 %v2362_v43  ;;  %1778 = vmatprep.subr.mxu1 %v2362_v43 }
 0x21b   :  { %1735 = vmatpush3.msra.mxu0 %v2362_v43  ;;  %1779 = vmatpush3.msra.mxu1 %v2362_v43 }
 0x21c   :  { %1736 = vmatprep.subr.mxu0 %v2364_v44  ;;  %1780 = vmatprep.subr.mxu1 %v2364_v44 }
 0x21d   :  { %1737 = vmatpush3.msra.mxu0 %v2364_v44  ;;  %1781 = vmatpush3.msra.mxu1 %v2364_v44 }
 0x21e   :  { %1738 = vmatprep.subr.mxu0 %v2358_v41  ;;  %1782 = vmatprep.subr.mxu1 %v2358_v41 }
 0x21f   :  { %1739 = vmatpush3.msra.mxu0 %v2358_v41  ;;  %1783 = vmatpush3.msra.mxu1 %v2358_v41 }
 0x220   :  { %1740 = vmatprep.subr.mxu0 %v2360_v42  ;;  %1784 = vmatprep.subr.mxu1 %v2360_v42 }
 0x221   :  { %1741 = vmatpush3.msra.mxu0 %v2360_v42  ;;  %1785 = vmatpush3.msra.mxu1 %v2360_v42 }
 0x222   :  { %1786 = vmatprep.subr.mxu1 %v2294_v30  ;;  %1742 = vmatprep.subr.mxu0 %v2294_v30 }
 0x223   :  { %1787 = vmatpush3.msra.mxu1 %v2294_v30  ;;  %1743 = vmatpush3.msra.mxu0 %v2294_v30 }
 0x224   :  { %1788 = vmatprep.subr.mxu1 %v2296_v31  ;;  %1744 = vmatprep.subr.mxu0 %v2296_v31 }
 0x225   :  { %1789 = vmatpush3.msra.mxu1 %v2296_v31  ;;  %1745 = vmatpush3.msra.mxu0 %v2296_v31 }
 0x226   :  { %1790 = vmatprep.subr.mxu1 %v2290_v28  ;;  %1746 = vmatprep.subr.mxu0 %v2290_v28 }
 0x227   :  { %1791 = vmatpush3.msra.mxu1 %v2290_v28  ;;  %1747 = vmatpush3.msra.mxu0 %v2290_v28 }
 0x228   :  { %1792 = vmatprep.subr.mxu1 %v2292_v29  ;;  %1748 = vmatprep.subr.mxu0 %v2292_v29 }
 0x229   :  { %1793 = vmatpush3.msra.mxu1 %v2292_v29  ;;  %1749 = vmatpush3.msra.mxu0 %v2292_v29 }
 0x22a   :  { %1794 = vmatprep.subr.mxu1 %v2286_v26  ;;  %1750 = vmatprep.subr.mxu0 %v2286_v26 }
 0x22b   :  { %1795 = vmatpush3.msra.mxu1 %v2286_v26  ;;  %1751 = vmatpush3.msra.mxu0 %v2286_v26 }
 0x22c   :  { %1796 = vmatprep.subr.mxu1 %v2288_v27  ;;  %1752 = vmatprep.subr.mxu0 %v2288_v27 }
 0x22d   :  { %1797 = vmatpush3.msra.mxu1 %v2288_v27  ;;  %1753 = vmatpush3.msra.mxu0 %v2288_v27 }
 0x22e   :  { %1798 = vmatprep.subr.mxu1 %v2282_v24  ;;  %1754 = vmatprep.subr.mxu0 %v2282_v24 }
 0x22f   :  { %1799 = vmatpush3.msra.mxu1 %v2282_v24  ;;  %1755 = vmatpush3.msra.mxu0 %v2282_v24 }
 0x230   :  { %1800 = vmatprep.subr.mxu1 %v2284_v25  ;;  %1756 = vmatprep.subr.mxu0 %v2284_v25 }
 0x231   :  { %1801 = vmatpush3.msra.mxu1 %v2284_v25  ;;  %1757 = vmatpush3.msra.mxu0 %v2284_v25 }
 0x232   :  { %1803 = vmatmul.mubr.f32.vlgmr.msra.gmra.mxu1 %v2331_v33  ;;  %1759 = vmatmul.mubr.f32.vlgmr.msra.gmra.mxu0 %v2434_v49 }
 0x233   :  { %1805 = vmatprep.mubr.f32.mxu1 %v2334_v34  ;;  %1761 = vmatprep.mubr.f32.mxu0 %v2438_v50 }
 0x236   :  { %1806 = vmatmul.mubr.f32.gmra.mxu1 %v2339_v35  ;;  %1762 = vmatmul.mubr.f32.gmra.mxu0 %v2446_v51 }
 0x237   :  { %1808 = vmatprep.mubr.f32.mxu1 %v2341_v36  ;;  %1764 = vmatprep.mubr.f32.mxu0 %v2448_v52 }
 0x23a   :  { %1809 = vmatmul.mubr.f32.gmra.mxu1 %v2345_v37  ;;  %1765 = vmatmul.mubr.f32.gmra.mxu0 %v2454_v53 }
 0x23b   :  { %1811 = vmatprep.mubr.f32.mxu1 %v2347_v38  ;;  %1767 = vmatprep.mubr.f32.mxu0 %v2456_v54 }
 0x23e   :  { %1812 = vmatmul.mubr.f32.gmra.mxu1 %v2351_v39  ;;  %1768 = vmatmul.mubr.f32.gmra.mxu0 %v2462_v55 }
 0x23f   :  { %1846 = vmatprep.mubr.f32.mxu0 %v2355_v40  ;;  %1890 = vmatprep.mubr.f32.mxu1 %v2306_v32 }
 0x2f2   :  { %v1804_v56 = vpop.f32.mrf.mxu1  ;;  %v2468_v57 = vpop.f32.mrf.mxu0 }
 0x2f4   :  { %v547_v58 = vpop.f32.mrf.mxu1  ;;  %v2470_v59 = vpop.f32.mrf.mxu0 }
 0x2f6   :  { %v1807_v60 = vpop.f32.mrf.mxu1  ;;  %v2472_v62 = vpop.f32.mrf.mxu0 }
 0x2f7   :  { %v597_v26 = vmul.f32 2.0, %v1807_v60 }
 0x2f8   :  { %v557_v61 = vpop.f32.mrf.mxu1  ;;  %v2474_v17 = vpop.f32.mrf.mxu0 }
 0x2fa   :  { %v1810_v63 = vpop.f32.mrf.mxu1  ;;  %v1766_v21 = vpop.f32.mrf.mxu0 }
 0x2fb   :  { %v599_v22 = vmul.f32 2.0, %v1810_v63 }
 0x2fc   :  { %v567_v16 = vpop.f32.mrf.mxu1 }
 0x2fd   :  { %v598_v24 = vmul.f32 2.0, %v567_v16  ;;  %v2487_v63 = vsub.f32 %v599_v22, %v2244_v13 }
 0x2fe   :  { %v1813_v18 = vpop.f32.mrf.mxu1 }
 0x2ff   :  { %v601_v19 = vmul.f32 2.0, %v1813_v18  ;;  %v462_v18 = vpop.f32.mrf.mxu0  ;;  %3136 = vst [vmem:[#allocation28_spill] sm:$0xff] %v2487_v63  ;;  %v2494_v16 = vsub.f32 %v598_v24, %v2242_v12  ;;  %v594_v24 = vmul.f32 2.0, %v547_v58 }
 0x300   :  { %v577_v20 = vpop.f32.mrf.mxu1 }
 0x301   :  { %v2477_v23 = vsub.f32 %v601_v19, %v2248_v15  ;;  %v600_v25 = vmul.f32 2.0, %v577_v20  ;;  %3137 = vst [vmem:[#allocation29_spill] sm:$0xff] %v2494_v16  ;;  %v1769_v60 = vpop.f32.mrf.mxu0  ;;  %v595_v19 = vmul.f32 2.0, %v1804_v56  ;;  %v2501_v20 = vsub.f32 %v597_v26, %v2240_v11 }
 0x302   :  { %v593_v56 = vmul.f32 2.0, %v1769_v60  ;;  %v2522_v58 = vsub.f32 %v594_v24, %v2234_v8  ;;  %v590_v24 = vmul.f32 2.0, %v462_v18  ;;  %v588_v18 = vmul.f32 2.0, %v2474_v17 }
 0x303   :  { %3134 = vst [vmem:[#allocation26_spill] sm:$0xff] %v2477_v23  ;;  %v2480_v27 = vsub.f32 %v600_v25, %v2246_v14  ;;  %1814 = vmatprep.subr.mxu0 %v2477_v23  ;;  %1858 = vmatprep.subr.mxu1 %v2477_v23  ;;  %v596_v25 = vmul.f32 2.0, %v557_v61  ;;  %3138 = vst [vmem:[#allocation30_spill] sm:$0xff] %v2501_v20  ;;  %v472_v26 = vpop.f32.mrf.mxu0  ;;  %v2515_v22 = vsub.f32 %v595_v19, %v2236_v9 }
 0x304   :  { %1815 = vmatpush3.msra.mxu0 %v2477_v23  ;;  %1859 = vmatpush3.msra.mxu1 %v2477_v23  ;;  %3140 = vst [vmem:[#allocation32_spill] sm:$0xff] %v2522_v58  ;;  %v592_v60 = vmul.f32 2.0, %v472_v26  ;;  %v591_v19 = vmul.f32 2.0, %v1766_v21  ;;  %v589_v21 = vmul.f32 2.0, %v2472_v62  ;;  %v587_v62 = vmul.f32 2.0, %v2468_v57 }
 0x305   :  { %3135 = vst [vmem:[#allocation27_spill] sm:$0xff] %v2480_v27  ;;  %1816 = vmatprep.subr.mxu0 %v2480_v27  ;;  %1860 = vmatprep.subr.mxu1 %v2480_v27  ;;  %v2508_v61 = vsub.f32 %v596_v25, %v2238_v10  ;;  %v2525_v25 = vsub.f32 %v593_v56, %v2232_v7  ;;  %v586_v17 = vmul.f32 2.0, %v2470_v59 }
 0x306   :  { %1817 = vmatpush3.msra.mxu0 %v2480_v27  ;;  %1861 = vmatpush3.msra.mxu1 %v2480_v27  ;;  %v2536_v56 = vsub.f32 %v592_v60, %v2230_v6  ;;  %v2544_v26 = vsub.f32 %v591_v19, %v2228_v5  ;;  %v2552_v60 = vsub.f32 %v590_v24, %v2226_v4 }
 0x307   :  { %1818 = vmatprep.subr.mxu0 %v2487_v63  ;;  %1862 = vmatprep.subr.mxu1 %v2487_v63  ;;  %3139 = vst [vmem:[#allocation31_spill] sm:$0xff] %v2508_v61  ;;  %3141 = vst [vmem:[#allocation33_spill] sm:$0xff] %v2525_v25  ;;  %v2560_v19 = vsub.f32 %v589_v21, %v2224_v3  ;;  %v2568_v24 = vsub.f32 %v588_v18, %v2222_v2 }
 0x308   :  { %1819 = vmatpush3.msra.mxu0 %v2487_v63  ;;  %1863 = vmatpush3.msra.mxu1 %v2487_v63  ;;  %3142 = vst [vmem:[#allocation34_spill] sm:$0xff] %v2536_v56  ;;  %3143 = vst [vmem:[#allocation35_spill] sm:$0xff] %v2544_v26  ;;  %v2575_v57 = vsub.f32 %v587_v62, %v2220_v1  ;;  %v2582_v59 = vsub.f32 %v586_v17, %v2218_v0 }
 0x309   :  { %1820 = vmatprep.subr.mxu0 %v2494_v16  ;;  %1864 = vmatprep.subr.mxu1 %v2494_v16  ;;  %3144 = vst [vmem:[#allocation36_spill] sm:$0xff] %v2552_v60  ;;  %3145 = vst [vmem:[#allocation37_spill] sm:$0xff] %v2560_v19 }
 0x30a   :  { %1821 = vmatpush3.msra.mxu0 %v2494_v16  ;;  %1865 = vmatpush3.msra.mxu1 %v2494_v16  ;;  %3146 = vst [vmem:[#allocation38_spill] sm:$0xff] %v2568_v24  ;;  %3147 = vst [vmem:[#allocation39_spill] sm:$0xff] %v2582_v59 }
 0x30b   :  { %1822 = vmatprep.subr.mxu0 %v2501_v20  ;;  %1866 = vmatprep.subr.mxu1 %v2501_v20 }
 0x30c   :  { %1823 = vmatpush3.msra.mxu0 %v2501_v20  ;;  %1867 = vmatpush3.msra.mxu1 %v2501_v20 }
 0x30d   :  { %1824 = vmatprep.subr.mxu0 %v2508_v61  ;;  %1868 = vmatprep.subr.mxu1 %v2508_v61 }
 0x30e   :  { %1825 = vmatpush3.msra.mxu0 %v2508_v61  ;;  %1869 = vmatpush3.msra.mxu1 %v2508_v61 }
 0x30f   :  { %1826 = vmatprep.subr.mxu0 %v2515_v22  ;;  %1870 = vmatprep.subr.mxu1 %v2515_v22 }
 0x310   :  { %1827 = vmatpush3.msra.mxu0 %v2515_v22  ;;  %1871 = vmatpush3.msra.mxu1 %v2515_v22 }
 0x311   :  { %1828 = vmatprep.subr.mxu0 %v2522_v58  ;;  %1872 = vmatprep.subr.mxu1 %v2522_v58 }
 0x312   :  { %1829 = vmatpush3.msra.mxu0 %v2522_v58  ;;  %1873 = vmatpush3.msra.mxu1 %v2522_v58 }
 0x313   :  { %1830 = vmatprep.subr.mxu0 %v2525_v25  ;;  %1874 = vmatprep.subr.mxu1 %v2525_v25 }
 0x314   :  { %1831 = vmatpush3.msra.mxu0 %v2525_v25  ;;  %1875 = vmatpush3.msra.mxu1 %v2525_v25 }
 0x315   :  { %1832 = vmatprep.subr.mxu0 %v2536_v56  ;;  %1876 = vmatprep.subr.mxu1 %v2536_v56 }
 0x316   :  { %1833 = vmatpush3.msra.mxu0 %v2536_v56  ;;  %1877 = vmatpush3.msra.mxu1 %v2536_v56 }
 0x317   :  { %1834 = vmatprep.subr.mxu0 %v2544_v26  ;;  %1878 = vmatprep.subr.mxu1 %v2544_v26 }
 0x318   :  { %1835 = vmatpush3.msra.mxu0 %v2544_v26  ;;  %1879 = vmatpush3.msra.mxu1 %v2544_v26 }
 0x319   :  { %1836 = vmatprep.subr.mxu0 %v2552_v60  ;;  %1880 = vmatprep.subr.mxu1 %v2552_v60 }
 0x31a   :  { %1837 = vmatpush3.msra.mxu0 %v2552_v60  ;;  %1881 = vmatpush3.msra.mxu1 %v2552_v60 }
 0x31b   :  { %1838 = vmatprep.subr.mxu0 %v2560_v19  ;;  %1882 = vmatprep.subr.mxu1 %v2560_v19 }
 0x31c   :  { %1839 = vmatpush3.msra.mxu0 %v2560_v19  ;;  %1883 = vmatpush3.msra.mxu1 %v2560_v19 }
 0x31d   :  { %1840 = vmatprep.subr.mxu0 %v2568_v24  ;;  %1884 = vmatprep.subr.mxu1 %v2568_v24 }
 0x31e   :  { %1841 = vmatpush3.msra.mxu0 %v2568_v24  ;;  %1885 = vmatpush3.msra.mxu1 %v2568_v24 }
 0x31f   :  { %1842 = vmatprep.subr.mxu0 %v2575_v57  ;;  %1886 = vmatprep.subr.mxu1 %v2575_v57 }
 0x320   :  { %1843 = vmatpush3.msra.mxu0 %v2575_v57  ;;  %1887 = vmatpush3.msra.mxu1 %v2575_v57 }
 0x321   :  { %1844 = vmatprep.subr.mxu0 %v2582_v59  ;;  %1888 = vmatprep.subr.mxu1 %v2582_v59 }
 0x322   :  { %1845 = vmatpush3.msra.mxu0 %v2582_v59  ;;  %1889 = vmatpush3.msra.mxu1 %v2582_v59 }
 0x323   :  { %1847 = vmatmul.mubr.f32.vlgmr.msra.gmra.mxu0 %v2434_v49  ;;  %1891 = vmatmul.mubr.f32.vlgmr.msra.gmra.mxu1 %v2331_v33 }
 0x324   :  { %1849 = vmatprep.mubr.f32.mxu0 %v2438_v50  ;;  %1893 = vmatprep.mubr.f32.mxu1 %v2334_v34 }
 0x327   :  { %1850 = vmatmul.mubr.f32.gmra.mxu0 %v2446_v51  ;;  %1894 = vmatmul.mubr.f32.gmra.mxu1 %v2339_v35 }
 0x328   :  { %1852 = vmatprep.mubr.f32.mxu0 %v2448_v52  ;;  %1896 = vmatprep.mubr.f32.mxu1 %v2341_v36 }
 0x32b   :  { %1853 = vmatmul.mubr.f32.gmra.mxu0 %v2454_v53  ;;  %1897 = vmatmul.mubr.f32.gmra.mxu1 %v2345_v37 }
 0x32c   :  { %1855 = vmatprep.mubr.f32.mxu0 %v2456_v54  ;;  %1899 = vmatprep.mubr.f32.mxu1 %v2347_v38 }
 0x32f   :  { %1856 = vmatmul.mubr.f32.gmra.mxu0 %v2462_v55  ;;  %1900 = vmatmul.mubr.f32.gmra.mxu1 %v2351_v39 }
 0x330   :  { %1934 = vmatprep.mubr.f32.mxu0 %v2355_v40  ;;  %1978 = vmatprep.mubr.f32.mxu1 %v2306_v32 }
 0x3e3   :  { %v2608_v21 = vpop.f32.mrf.mxu0  ;;  %v1892_v18 = vpop.f32.mrf.mxu1 }
 0x3e5   :  { %v2610_v62 = vpop.f32.mrf.mxu0  ;;  %v826_v17 = vpop.f32.mrf.mxu1 }
 0x3e7   :  { %v1895_v27 = vpop.f32.mrf.mxu1  ;;  %v2612_v56 = vpop.f32.mrf.mxu0 }
 0x3e9   :  { %v836_v23 = vpop.f32.mrf.mxu1  ;;  %v2614_v16 = vpop.f32.mrf.mxu0 }
 0x3eb   :  { %v1898_v25 = vpop.f32.mrf.mxu1  ;;  %v1854_v24 = vpop.f32.mrf.mxu0 }
 0x3ec   :  { %v878_v61 = vmul.f32 2.0, %v1898_v25 }
 0x3ed   :  { %v846_v60 = vpop.f32.mrf.mxu1  ;;  %v741_v59 = vpop.f32.mrf.mxu0 }
 0x3ee   :  { %v877_v58 = vmul.f32 2.0, %v846_v60  ;;  %v2627_v25 = vsub.f32 %v878_v61, %v2366_v45  ;;  %v874_v61 = vmul.f32 2.0, %v1892_v18 }
 0x3ef   :  { %v1901_v63 = vpop.f32.mrf.mxu1 }
 0x3f0   :  { %v880_v26 = vmul.f32 2.0, %v1901_v63  ;;  %v876_v63 = vmul.f32 2.0, %v1895_v27  ;;  %v1857_v27 = vpop.f32.mrf.mxu0 }
 0x3f1   :  { %v856_v40 = vpop.f32.mrf.mxu1 }
 0x3f2   :  { %v2617_v32 = vsub.f32 %v880_v26, %v2370_v47  ;;  %v879_v20 = vmul.f32 2.0, %v856_v40  ;;  %v2634_v26 = vsub.f32 %v877_v58, %v2368_v46  ;;  %v2641_v60 = vsub.f32 %v876_v63, %v2362_v43  ;;  %v751_v18 = vpop.f32.mrf.mxu0 }
 0x3f3   :  { %v2655_v40 = vsub.f32 %v874_v61, %v2358_v41  ;;  %v872_v63 = vmul.f32 2.0, %v1857_v27  ;;  %v870_v27 = vmul.f32 2.0, %v1854_v24  ;;  %v868_v24 = vmul.f32 2.0, %v2612_v56 }
 0x3f4   :  { %3148 = vst [vmem:[#allocation40_spill] sm:$0xff] %v2617_v32  ;;  %v2620_v19 = vsub.f32 %v879_v20, %v2374_v48  ;;  %1902 = vmatprep.subr.mxu0 %v2617_v32  ;;  %1946 = vmatprep.subr.mxu1 %v2617_v32  ;;  %v875_v20 = vmul.f32 2.0, %v836_v23  ;;  %v873_v23 = vmul.f32 2.0, %v826_v17  ;;  %v866_v56 = vmul.f32 2.0, %v2608_v21  ;;  %v3153_v21 = vld [vmem:[#allocation22_spill] sm:$0xff] }
 0x3f5   :  { %1903 = vmatpush3.msra.mxu0 %v2617_v32  ;;  %1947 = vmatpush3.msra.mxu1 %v2617_v32  ;;  %v2669_v61 = vsub.f32 %v872_v63, %v2294_v30  ;;  %v2684_v63 = vsub.f32 %v870_v27, %v2290_v28  ;;  %v3151_v27 = vld [vmem:[#allocation24_spill] sm:$0xff] }
 0x3f6   :  { %3149 = vst [vmem:[#allocation41_spill] sm:$0xff] %v2620_v19  ;;  %1904 = vmatprep.subr.mxu0 %v2620_v19  ;;  %1948 = vmatprep.subr.mxu1 %v2620_v19  ;;  %v2648_v58 = vsub.f32 %v875_v20, %v2364_v44  ;;  %v2662_v17 = vsub.f32 %v873_v23, %v2360_v42  ;;  %v871_v20 = vmul.f32 2.0, %v751_v18  ;;  %v869_v23 = vmul.f32 2.0, %v741_v59 }
 0x3f7   :  { %1905 = vmatpush3.msra.mxu0 %v2620_v19  ;;  %1949 = vmatpush3.msra.mxu1 %v2620_v19  ;;  %3150 = vst [vmem:[#allocation42_spill] sm:$0xff] %v2669_v61  ;;  %v867_v59 = vmul.f32 2.0, %v2614_v16  ;;  %v2700_v19 = vsub.f32 %v868_v24, %v3151_v27  ;;  %v865_v16 = vmul.f32 2.0, %v2610_v62  ;;  %v2715_v24 = vsub.f32 %v866_v56, %v3153_v21  ;;  %v3154_v62 = vld [vmem:[#allocation23_spill] sm:$0xff] }
 0x3f8   :  { %1906 = vmatprep.subr.mxu0 %v2627_v25  ;;  %1950 = vmatprep.subr.mxu1 %v2627_v25  ;;  %v2676_v18 = vsub.f32 %v871_v20, %v2296_v31  ;;  %v2692_v20 = vsub.f32 %v869_v23, %v2292_v29  ;;  %v3152_v23 = vld [vmem:[#allocation25_spill] sm:$0xff] }
 0x3f9   :  { %1907 = vmatpush3.msra.mxu0 %v2627_v25  ;;  %1951 = vmatpush3.msra.mxu1 %v2627_v25  ;;  %v2708_v32 = vsub.f32 %v867_v59, %v3152_v23  ;;  %v2722_v59 = vsub.f32 %v865_v16, %v3154_v62 }
 0x3fa   :  { %1908 = vmatprep.subr.mxu0 %v2634_v26  ;;  %1952 = vmatprep.subr.mxu1 %v2634_v26 }
 0x3fb   :  { %1909 = vmatpush3.msra.mxu0 %v2634_v26  ;;  %1953 = vmatpush3.msra.mxu1 %v2634_v26 }
 0x3fc   :  { %1910 = vmatprep.subr.mxu0 %v2641_v60  ;;  %1954 = vmatprep.subr.mxu1 %v2641_v60 }
 0x3fd   :  { %1911 = vmatpush3.msra.mxu0 %v2641_v60  ;;  %1955 = vmatpush3.msra.mxu1 %v2641_v60 }
 0x3fe   :  { %1912 = vmatprep.subr.mxu0 %v2648_v58  ;;  %1956 = vmatprep.subr.mxu1 %v2648_v58 }
 0x3ff   :  { %1913 = vmatpush3.msra.mxu0 %v2648_v58  ;;  %1957 = vmatpush3.msra.mxu1 %v2648_v58 }
 0x400   :  { %1914 = vmatprep.subr.mxu0 %v2655_v40  ;;  %1958 = vmatprep.subr.mxu1 %v2655_v40 }
 0x401   :  { %1915 = vmatpush3.msra.mxu0 %v2655_v40  ;;  %1959 = vmatpush3.msra.mxu1 %v2655_v40 }
 0x402   :  { %1916 = vmatprep.subr.mxu0 %v2662_v17  ;;  %1960 = vmatprep.subr.mxu1 %v2662_v17 }
 0x403   :  { %1917 = vmatpush3.msra.mxu0 %v2662_v17  ;;  %1961 = vmatpush3.msra.mxu1 %v2662_v17 }
 0x404   :  { %1918 = vmatprep.subr.mxu0 %v2669_v61  ;;  %1962 = vmatprep.subr.mxu1 %v2669_v61 }
 0x405   :  { %1919 = vmatpush3.msra.mxu0 %v2669_v61  ;;  %1963 = vmatpush3.msra.mxu1 %v2669_v61  ;;  %v3168_v61 = vld [vmem:[#allocation29_spill] sm:$0xff] }
 0x406   :  { %1920 = vmatprep.subr.mxu0 %v2676_v18  ;;  %1964 = vmatprep.subr.mxu1 %v2676_v18 }
 0x407   :  { %1921 = vmatpush3.msra.mxu0 %v2676_v18  ;;  %1965 = vmatpush3.msra.mxu1 %v2676_v18 }
 0x408   :  { %1922 = vmatprep.subr.mxu0 %v2684_v63  ;;  %1966 = vmatprep.subr.mxu1 %v2684_v63 }
 0x409   :  { %1923 = vmatpush3.msra.mxu0 %v2684_v63  ;;  %1967 = vmatpush3.msra.mxu1 %v2684_v63 }
 0x40a   :  { %1924 = vmatprep.subr.mxu0 %v2692_v20  ;;  %1968 = vmatprep.subr.mxu1 %v2692_v20 }
 0x40b   :  { %1925 = vmatpush3.msra.mxu0 %v2692_v20  ;;  %1969 = vmatpush3.msra.mxu1 %v2692_v20 }
 0x40c   :  { %1926 = vmatprep.subr.mxu0 %v2700_v19  ;;  %1970 = vmatprep.subr.mxu1 %v2700_v19 }
 0x40d   :  { %1927 = vmatpush3.msra.mxu0 %v2700_v19  ;;  %1971 = vmatpush3.msra.mxu1 %v2700_v19 }
 0x40e   :  { %1928 = vmatprep.subr.mxu0 %v2708_v32  ;;  %1972 = vmatprep.subr.mxu1 %v2708_v32 }
 0x40f   :  { %1929 = vmatpush3.msra.mxu0 %v2708_v32  ;;  %1973 = vmatpush3.msra.mxu1 %v2708_v32 }
 0x410   :  { %1930 = vmatprep.subr.mxu0 %v2715_v24  ;;  %1974 = vmatprep.subr.mxu1 %v2715_v24 }
 0x411   :  { %1931 = vmatpush3.msra.mxu0 %v2715_v24  ;;  %1975 = vmatpush3.msra.mxu1 %v2715_v24 }
 0x412   :  { %1932 = vmatprep.subr.mxu0 %v2722_v59  ;;  %1976 = vmatprep.subr.mxu1 %v2722_v59 }
 0x413   :  { %1933 = vmatpush3.msra.mxu0 %v2722_v59  ;;  %1977 = vmatpush3.msra.mxu1 %v2722_v59 }
 0x414   :  { %1935 = vmatmul.mubr.f32.vlgmr.msra.gmra.mxu0 %v2434_v49  ;;  %1979 = vmatmul.mubr.f32.vlgmr.msra.gmra.mxu1 %v2331_v33  ;;  %v1439_v33 = vld [vmem:[#allocation8] ss:$0 sm:$0xff] }
 0x415   :  { %1937 = vmatprep.mubr.f32.mxu0 %v2438_v50  ;;  %1981 = vmatprep.mubr.f32.mxu1 %v2334_v34  ;;  %v1440_v34 = vld [vmem:[#allocation8 + $0x1] ss:$0 sm:$0xff]  ;;  %v318_v56 = vmul.f32 %v1439_v33, %v2224_v3 }
 0x416   :  { %v345_v49 = vmul.f32 %v2358_v41, %v1440_v34  ;;  %v344_v50 = vmul.f32 %v1440_v34, %v2360_v42  ;;  %v348_v41 = vmul.f32 %v1440_v34, %v2368_v46  ;;  %v2759_v42 = vmul.f32 %v1439_v33, %v2248_v15 }
 0x417   :  { %v339_v15 = vmul.f32 %v3151_v27, %v1440_v34  ;;  %v2771_v16 = vmul.f32 %v2370_v47, %v1440_v34  ;;  %v319_v27 = vmul.f32 %v1439_v33, %v2226_v4  ;;  %v340_v47 = vmul.f32 %v1440_v34, %v2292_v29 }
 0x418   :  { %1938 = vmatmul.mubr.f32.gmra.mxu0 %v2446_v51  ;;  %1982 = vmatmul.mubr.f32.gmra.mxu1 %v2339_v35  ;;  %v324_v35 = vmul.f32 %v1439_v33, %v2236_v9  ;;  %v325_v51 = vmul.f32 %v1439_v33, %v2238_v10  ;;  %v349_v9 = vmul.f32 %v2366_v45, %v1440_v34 }
 0x419   :  { %1940 = vmatprep.mubr.f32.mxu0 %v2448_v52  ;;  %1984 = vmatprep.mubr.f32.mxu1 %v2341_v36  ;;  %v323_v36 = vmul.f32 %v1439_v33, %v2234_v8  ;;  %v327_v52 = vmul.f32 %v1439_v33, %v2242_v12  ;;  %3155 = vst [vmem:[#allocation24_spill] sm:$0xff] %v2759_v42  ;;  %3157 = vst [vmem:[#allocation22_spill] sm:$0xff] %v2771_v16 }
 0x41a   :  { %v316_v10 = vmul.f32 %v1439_v33, %v2220_v1  ;;  %v337_v12 = vmul.f32 %v3153_v21, %v1440_v34  ;;  %v2776_v1 = vld [vmem:[#allocation8 + $0x2] ss:$0 sm:$0xff]  ;;  %v338_v21 = vmul.f32 %v1440_v34, %v3152_v23  ;;  %v355_v4 = vadd.f32 %v339_v15, %v318_v56 }
 0x41b   :  { %v360_v8 = vadd.f32 %v344_v50, %v323_v36  ;;  %v364_v46 = vadd.f32 %v348_v41, %v327_v52  ;;  %v322_v36 = vmul.f32 %v1439_v33, %v2232_v7  ;;  %v321_v50 = vmul.f32 %v1439_v33, %v2230_v6  ;;  %v3161_v7 = vld [vmem:[#allocation32_spill] sm:$0xff] }
 0x41c   :  { %1941 = vmatmul.mubr.f32.gmra.mxu0 %v2454_v53  ;;  %1985 = vmatmul.mubr.f32.gmra.mxu1 %v2345_v37  ;;  %v326_v37 = vmul.f32 %v1439_v33, %v2240_v11  ;;  %v346_v53 = vmul.f32 %v1440_v34, %v2364_v44  ;;  %v2762_v11 = vmul.f32 %v1439_v33, %v2246_v14 }
 0x41d   :  { %1943 = vmatprep.mubr.f32.mxu0 %v2456_v54  ;;  %1987 = vmatprep.mubr.f32.mxu1 %v2347_v38  ;;  %v328_v38 = vmul.f32 %v1439_v33, %v2244_v13  ;;  %v361_v54 = vadd.f32 %v345_v49, %v324_v35  ;;  %v315_v13 = vmul.f32 %v1439_v33, %v2218_v0 }
 0x41e   :  { %3156 = vst [vmem:[#allocation25_spill] sm:$0xff] %v2762_v11  ;;  %v362_v45 = vadd.f32 %v346_v53, %v325_v51  ;;  %v2774_v14 = vmul.f32 %v1440_v34, %v2374_v48  ;;  %v317_v0 = vmul.f32 %v1439_v33, %v2222_v2  ;;  %v341_v35 = vmul.f32 %v2290_v28, %v1440_v34  ;;  %v3159_v28 = vld [vmem:[#allocation39_spill] sm:$0xff]  ;;  %v3160_v51 = vld [vmem:[#allocation37_spill] sm:$0xff] }
 0x41f   :  { %v353_v49 = vadd.f32 %v337_v12, %v316_v10  ;;  %v343_v48 = vmul.f32 %v2294_v30, %v1440_v34  ;;  %v342_v2 = vmul.f32 %v1440_v34, %v2296_v31  ;;  %v632_v23 = vmul.f32 %v2776_v1, %v2515_v22  ;;  %v3166_v12 = vld [vmem:[#allocation28_spill] sm:$0xff] }
 0x420   :  { %1944 = vmatmul.mubr.f32.gmra.mxu0 %v2462_v55  ;;  %1988 = vmatmul.mubr.f32.gmra.mxu1 %v2351_v39  ;;  %v347_v39 = vmul.f32 %v2362_v43, %v1440_v34  ;;  %v336_v43 = vmul.f32 %v1440_v34, %v3154_v62  ;;  %v365_v55 = vadd.f32 %v349_v9, %v328_v38  ;;  %v3163_v34 = vld [vmem:[#allocation31_spill] sm:$0xff]  ;;  %v1213_v11 = vlaneseq }
 0x421   :  { %3158 = vst [vmem:[#allocation23_spill] sm:$0xff] %v2774_v14  ;;  %v320_v62 = vmul.f32 %v1439_v33, %v2228_v5  ;;  %v624_v5 = vmul.f32 %v2776_v1, %v2575_v57  ;;  %v626_v29 = vmul.f32 %v2776_v1, %v3160_v51  ;;  %v631_v30 = vmul.f32 %v2776_v1, %v3161_v7  ;;  %v3162_v33 = vld [vmem:[#allocation30_spill] sm:$0xff]  ;;  %v3165_v9 = vld [vmem:[#allocation35_spill] sm:$0xff] }
 0x422   :  { %v363_v44 = vadd.f32 %v347_v39, %v326_v37  ;;  %v352_v3 = vadd.f32 %v336_v43, %v315_v13  ;;  %v623_v37 = vmul.f32 %v2776_v1, %v3159_v28  ;;  %v354_v38 = vadd.f32 %v338_v21, %v317_v0  ;;  %v3164_v39 = vld [vmem:[#allocation38_spill] sm:$0xff]  ;;  %v2812_v0 = vld [vmem:[#allocation8 + $0x3] ss:$0 sm:$0xff] }
 0x423   :  { %v357_v6 = vadd.f32 %v341_v35, %v320_v62  ;;  %v634_v31 = vmul.f32 %v2776_v1, %v3162_v33  ;;  %v633_v52 = vmul.f32 %v2776_v1, %v3163_v34  ;;  %v625_v53 = vmul.f32 %v2776_v1, %v3164_v39  ;;  %v3167_v35 = vld [vmem:[#allocation36_spill] sm:$0xff] }
 0x424   :  { %v628_v41 = vmul.f32 %v2776_v1, %v3165_v9  ;;  %v356_v10 = vadd.f32 %v340_v47, %v319_v27  ;;  %v636_v13 = vmul.f32 %v2776_v1, %v3166_v12  ;;  %v2808_v43 = vadd.f32 %v343_v48, %v322_v36 }
 0x425   :  { %v2810_v56 = vadd.f32 %v342_v2, %v321_v50  ;;  %v648_v15 = vadd.f32 %v632_v23, %v361_v54  ;;  %v640_v21 = vadd.f32 %v624_v5, %v353_v49  ;;  %v639_v62 = vadd.f32 %v623_v37, %v352_v3  ;;  %v3169_v37 = vld [vmem:[#allocation33_spill] sm:$0xff] }
 0x426   :  { %v627_v14 = vmul.f32 %v2776_v1, %v3167_v35  ;;  %v642_v16 = vadd.f32 %v626_v29, %v355_v4  ;;  %v647_v42 = vadd.f32 %v631_v30, %v360_v8  ;;  %v635_v27 = vmul.f32 %v2776_v1, %v3168_v61 }
 0x427   :  { %v2818_v47 = vadd.f32 %v634_v31, %v363_v44  ;;  %v2820_v36 = vadd.f32 %v633_v52, %v362_v45  ;;  %v2822_v48 = vadd.f32 %v625_v53, %v354_v38  ;;  %v2824_v54 = vadd.f32 %v628_v41, %v357_v6  ;;  %v2852_v53 = vld [vmem:[#allocation8 + $0x4] ss:$0 sm:$0xff] }
 0x428   :  { %v911_v3 = vmul.f32 %v2812_v0, %v2655_v40  ;;  %v903_v2 = vmul.f32 %v2812_v0, %v2715_v24  ;;  %v902_v8 = vmul.f32 %v2812_v0, %v2722_v59  ;;  %v2832_v23 = vadd.f32 %v636_v13, %v365_v55  ;;  %v3170_v59 = vld [vmem:[#allocation26_spill] sm:$0xff] }
 0x429   :  { %v2834_v5 = vadd.f32 %v627_v14, %v356_v10  ;;  %v2838_v4 = vmul.f32 %v2776_v1, %v3169_v37  ;;  %v2840_v38 = vand.u32 127, %v1213_v11  ;;  %v910_v40 = vmul.f32 %v2812_v0, %v2662_v17 }
 0x42a   :  { %v2844_v24 = vadd.f32 %v635_v27, %v364_v46  ;;  %v2848_v55 = vmul.f32 %v2776_v1, %v3170_v59  ;;  %v927_v10 = vadd.f32 %v911_v3, %v648_v15  ;;  %v919_v13 = vadd.f32 %v903_v2, %v640_v21 }
 0x42b   :  { %v905_v17 = vmul.f32 %v2812_v0, %v2700_v19  ;;  %v913_v15 = vmul.f32 %v2812_v0, %v2641_v60  ;;  %vm1215_vm0 = vcmp.lt.s32.totalorder %v2840_v38, 4 }
 0x4d4   :  { %v1936_v50 = vpop.f32.mrf.mxu0  ;;  %v1980_v49 = vpop.f32.mrf.mxu1 }
 0x4d5   :  { %v1145_v44 = vmul.f32 2.0, %v1936_v50  ;;  %v1153_v45 = vmul.f32 2.0, %v1980_v49  ;;  %v918_v50 = vadd.f32 %v902_v8, %v639_v62 }
 0x4d6   :  { %v1000_v29 = vpop.f32.mrf.mxu0  ;;  %v1105_v30 = vpop.f32.mrf.mxu1 }
 0x4d7   :  { %v1161_v14 = vsub.f32 %v1145_v44, %v2575_v57  ;;  %v1169_v6 = vsub.f32 %v1153_v45, %v2515_v22  ;;  %v1144_v31 = vmul.f32 2.0, %v1000_v29  ;;  %v1152_v52 = vmul.f32 2.0, %v1105_v30 }
 0x4d8   :  { %v1939_v41 = vpop.f32.mrf.mxu0  ;;  %v1983_v11 = vpop.f32.mrf.mxu1  ;;  %v926_v30 = vadd.f32 %v910_v40, %v647_v42  ;;  %v921_v40 = vadd.f32 %v905_v17, %v642_v16 }
 0x4d9   :  { %v1160_v46 = vsub.f32 %v1144_v31, %v3159_v28  ;;  %v1168_v27 = vsub.f32 %v1152_v52, %v3161_v7  ;;  %v1147_v49 = vmul.f32 2.0, %v1939_v41  ;;  %v1155_v57 = vmul.f32 2.0, %v1983_v11 }
 0x4da   :  { %v1010_v44 = vpop.f32.mrf.mxu0  ;;  %v1115_v22 = vpop.f32.mrf.mxu1  ;;  %v1190_v45 = vmul.f32 %v2852_v53, %v1169_v6  ;;  %v1182_v29 = vmul.f32 %v2852_v53, %v1161_v14 }
 0x4db   :  { %v1163_v21 = vsub.f32 %v1147_v49, %v3160_v51  ;;  %v1171_v19 = vsub.f32 %v1155_v57, %v3162_v33  ;;  %v1154_v62 = vmul.f32 2.0, %v1115_v22  ;;  %v1146_v28 = vmul.f32 2.0, %v1010_v44 }
 0x4dc   :  { %v1942_v7 = vpop.f32.mrf.mxu0  ;;  %v1986_v3 = vpop.f32.mrf.mxu1  ;;  %v1206_v2 = vadd.f32 %v1190_v45, %v927_v10  ;;  %v1198_v8 = vadd.f32 %v1182_v29, %v919_v13  ;;  %v1181_v6 = vmul.f32 %v2852_v53, %v1160_v46  ;;  %v1189_v60 = vmul.f32 %v2852_v53, %v1168_v27 }
 0x4dd   :  { %v1170_v14 = vsub.f32 %v1154_v62, %v3163_v34  ;;  %v1149_v42 = vmul.f32 2.0, %v1942_v7  ;;  %v1184_v11 = vmul.f32 %v2852_v53, %v1163_v21  ;;  %v929_v34 = vadd.f32 %v913_v15, %v2818_v47 }
 0x4de   :  { %v2870_v51 = vsel %vm1215_vm0, %v1206_v2, -inf  ;;  %v1125_v33 = vpop.f32.mrf.mxu1  ;;  %v2874_v31 = vsel %vm1215_vm0, %v1198_v8, -inf  ;;  %v1020_v52 = vpop.f32.mrf.mxu0  ;;  %v1197_v41 = vadd.f32 %v1181_v6, %v918_v50  ;;  %v912_v10 = vmul.f32 %v2812_v0, %v2648_v58 }
 0x4df   :  { %1250 = vmax.xlane.f32.xlu1 %v2870_v51  ;;  %1234 = vmax.xlane.f32.xlu0 %v2874_v31  ;;  %v1148_v16 = vmul.f32 2.0, %v1020_v52  ;;  %v904_v13 = vmul.f32 %v2812_v0, %v2708_v32  ;;  %v1162_v17 = vsub.f32 %v1146_v28, %v3164_v39  ;;  %v1157_v46 = vmul.f32 2.0, %v1986_v3 }
 0x4e0   :  { %v1945_v27 = vpop.f32.mrf.mxu0  ;;  %v1200_v50 = vadd.f32 %v1184_v11, %v921_v40  ;;  %v1192_v49 = vmul.f32 %v2852_v53, %v1171_v19  ;;  %v1165_v57 = vsub.f32 %v1149_v42, %v3165_v9  ;;  %v1156_v44 = vmul.f32 2.0, %v1125_v33  ;;  %v1989_v45 = vpop.f32.mrf.mxu1 }
 0x4e1   :  { %v2889_v22 = vsel %vm1215_vm0, %v1197_v41, -inf  ;;  %v1205_v47 = vadd.f32 %v1189_v60, %v926_v30  ;;  %v1164_v58 = vsub.f32 %v1148_v16, %v3167_v35  ;;  %v1191_v15 = vmul.f32 %v2852_v53, %v1170_v14  ;;  %v3171_v14 = vld [vmem:[#allocation34_spill] sm:$0xff] }
 0x4e2   :  { %v2894_v32 = vsel %vm1215_vm0, %v1200_v50, -inf  ;;  %v1030_v39 = vpop.f32.mrf.mxu0  ;;  %v1208_v29 = vadd.f32 %v1192_v49, %v929_v34  ;;  %v928_v9 = vadd.f32 %v912_v10, %v2820_v36  ;;  %v920_v21 = vadd.f32 %v904_v13, %v2822_v48  ;;  %v1135_v48 = vpop.f32.mrf.mxu1  ;;  %v3172_v13 = vld [vmem:[#allocation27_spill] sm:$0xff]  ;;  %v3173_v50 = vld [vmem:[#allocation42_spill] sm:$0xff] }
 0x4e3   :  { %1232 = vmax.xlane.f32.xlu0 %v2889_v22  ;;  %1238 = vmax.xlane.f32.xlu1 %v2894_v32  ;;  %v907_v35 = vmul.f32 %v2812_v0, %v2684_v63  ;;  %v1173_v30 = vsub.f32 %v1157_v46, %v3166_v12  ;;  %v1151_v19 = vmul.f32 2.0, %v1945_v27  ;;  %v1183_v62 = vmul.f32 %v2852_v53, %v1162_v17 }
 0x4e4   :  { %v906_v28 = vmul.f32 %v2812_v0, %v2692_v20  ;;  %v1172_v7 = vsub.f32 %v1156_v44, %v3168_v61  ;;  %v1150_v3 = vmul.f32 2.0, %v1030_v39  ;;  %v2910_v2 = vsel %vm1215_vm0, %v1205_v47, -inf  ;;  %v3176_v39 = vld [vmem:[#allocation25_spill] sm:$0xff] }
 0x4e5   :  { %v1186_v36 = vmul.f32 %v2852_v53, %v1165_v57  ;;  %v2915_v63 = vsel %vm1215_vm0, %v1208_v29, -inf  ;;  %v1207_v12 = vadd.f32 %v1191_v15, %v928_v9  ;;  %v1199_v8 = vadd.f32 %v1183_v62, %v920_v21  ;;  %v3177_v29 = vld [vmem:[#allocation23_spill] sm:$0xff]  ;;  %v3178_v21 = vld [vmem:[#allocation40_spill] sm:$0xff] }
 0x4e6   :  { %v1185_v6 = vmul.f32 %v2852_v53, %v1164_v58  ;;  %v923_v61 = vadd.f32 %v907_v35, %v2824_v54  ;;  %v915_v20 = vmul.f32 %v2812_v0, %v2627_v25  ;;  %v629_v42 = vmul.f32 %v2776_v1, %v3171_v14  ;;  %v3175_v58 = vld [vmem:[#allocation22_spill] sm:$0xff] }
 0x4e7   :  { %1248 = vmax.xlane.f32.xlu0 %v2910_v2  ;;  %1254 = vmax.xlane.f32.xlu1 %v2915_v63  ;;  %v1167_v40 = vsub.f32 %v1151_v19, %v3169_v37  ;;  %v1159_v60 = vmul.f32 2.0, %v1989_v45  ;;  %v922_v33 = vadd.f32 %v906_v28, %v2834_v5  ;;  %v914_v52 = vmul.f32 %v2812_v0, %v2634_v26 }
 0x4e8   :  { %v1158_v41 = vmul.f32 2.0, %v1135_v48  ;;  %v1166_v11 = vsub.f32 %v1150_v3, %v3171_v14  ;;  %v1202_v16 = vadd.f32 %v1186_v36, %v923_v61  ;;  %v1194_v54 = vmul.f32 %v2852_v53, %v1173_v30  ;;  %v3179_v30 = vld [vmem:[#allocation41_spill] sm:$0xff] }
 0x4e9   :  { %v2933_v25 = vsel %vm1215_vm0, %v1207_v12, -inf  ;;  %v2937_v34 = vsel %vm1215_vm0, %v1199_v8, -inf  ;;  %v1201_v37 = vadd.f32 %v1185_v6, %v922_v33  ;;  %v1193_v5 = vmul.f32 %v2852_v53, %v1172_v7 }
 0x4ea   :  { %v646_v26 = vadd.f32 %v2838_v4, %v2808_v43  ;;  %v908_v10 = vmul.f32 %v2812_v0, %v2676_v18  ;;  %v637_v17 = vmul.f32 %v2776_v1, %v3172_v13  ;;  %v931_v46 = vadd.f32 %v915_v20, %v2832_v23 }
 0x4eb   :  { %1252 = vmax.xlane.f32.xlu0 %v2933_v25  ;;  %1236 = vmax.xlane.f32.xlu1 %v2937_v34  ;;  %v930_v27 = vadd.f32 %v914_v52, %v2844_v24  ;;  %v909_v49 = vmul.f32 %v2812_v0, %v3173_v50  ;;  %v645_v57 = vadd.f32 %v629_v42, %v2810_v56  ;;  %v2958_v18 = vsel %vm1215_vm0, %v1202_v16, -inf }
 0x4ec   :  { %v1175_v44 = vsub.f32 %v1159_v60, %v3170_v59  ;;  %v1174_v47 = vsub.f32 %v1158_v41, %v3172_v13  ;;  %v1187_v43 = vmul.f32 %v2852_v53, %v1166_v11  ;;  %v2962_v1 = vsel %vm1215_vm0, %v1201_v37, -inf  ;;  %v3174_v59 = vld [vmem:[#allocation24_spill] sm:$0xff] }
 0x4ed   :  { %v1210_v23 = vadd.f32 %v1194_v54, %v931_v46  ;;  %v1209_v4 = vadd.f32 %v1193_v5, %v930_v27  ;;  %v1188_v24 = vmul.f32 %v2852_v53, %v1167_v40  ;;  %v924_v56 = vadd.f32 %v908_v10, %v645_v57 }
 0x4ee   :  { %v367_v45 = vadd.f32 %v3175_v58, %v3174_v59  ;;  %v366_v15 = vadd.f32 %v3177_v29, %v3176_v39  ;;  %v925_v9 = vadd.f32 %v909_v49, %v646_v26  ;;  %v917_v35 = vmul.f32 %v2812_v0, %v3178_v21 }
 0x4ef   :  { %1242 = vmax.xlane.f32.xlu1 %v2958_v18  ;;  %1240 = vmax.xlane.f32.xlu0 %v2962_v1  ;;  %v916_v19 = vmul.f32 %v2812_v0, %v3179_v30  ;;  %v1195_v62 = vmul.f32 %v2852_v53, %v1174_v47  ;;  %v1203_v28 = vadd.f32 %v1187_v43, %v924_v56  ;;  %v1229_v36 = vsel %vm1215_vm0, %v1210_v23, -inf }
 0x4f0   :  { %v654_v7 = vadd.f32 %v2848_v55, %v367_v45  ;;  %v653_v3 = vadd.f32 %v637_v17, %v366_v15  ;;  %v1228_v48 = vsel %vm1215_vm0, %v1209_v4, -inf  ;;  %v1204_v12 = vadd.f32 %v1188_v24, %v925_v9 }
 0x4f1   :  { %v1196_v8 = vmul.f32 %v2852_v53, %v1175_v44  ;;  %v2988_v55 = vsel %vm1215_vm0, %v1203_v28, -inf }
 0x4f2   :  { %v933_v6 = vadd.f32 %v917_v35, %v654_v7  ;;  %v932_v61 = vadd.f32 %v916_v19, %v653_v3  ;;  %v2984_v0 = vsel %vm1215_vm0, %v1204_v12, -inf }
 0x4f3   :  { %1258 = vmax.xlane.f32.xlu1 %v1229_v36  ;;  %1256 = vmax.xlane.f32.xlu0 %v1228_v48 }
 0x4f4   :  { %v1212_v20 = vadd.f32 %v1196_v8, %v933_v6  ;;  %v1211_v14 = vadd.f32 %v1195_v62, %v932_v61 }
 0x4f6   :  { %v2994_v53 = vsel %vm1215_vm0, %v1212_v20, -inf  ;;  %v2998_v42 = vsel %vm1215_vm0, %v1211_v14, -inf }
 0x4f7   :  { %1246 = vmax.xlane.f32.xlu1 %v2984_v0  ;;  %1244 = vmax.xlane.f32.xlu0 %v2988_v55 }
 0x4fb   :  { %1262 = vmax.xlane.f32.xlu1 %v2994_v53  ;;  %1260 = vmax.xlane.f32.xlu0 %v2998_v42 }
 0x568   :  { %v1251_v40 = vpop.xlane.xlu1 %1250  ;;  %v1235_v60 = vpop.xlane.xlu0 %1234 }
 0x569   :  { %v3003_v33 = vsub.f32 %v2874_v31, %v1235_v60  ;;  %v3006_v52 = vsub.f32 %v2870_v51, %v1251_v40 }
 0x56b   :  { %v1282_v41 = vmul.f32 1.442695, %v3003_v33  ;;  %v1298_v54 = vmul.f32 1.442695, %v3006_v52 }
 0x56c   :  { %v1233_v11 = vpop.xlane.xlu0 %1232  ;;  %v1239_v16 = vpop.xlane.xlu1 %1238 }
 0x56d   :  { %v3010_v38 = vsub.f32 %v2889_v22, %v1233_v11  ;;  %1997 = vpow2.f32 %v1282_v41  ;;  %v3014_v37 = vsub.f32 %v2894_v32, %v1239_v16 }
 0x56f   :  { %v1280_v5 = vmul.f32 1.442695, %v3010_v38  ;;  %v1286_v22 = vmul.f32 1.442695, %v3014_v37 }
 0x570   :  { %v1249_v31 = vpop.xlane.xlu0 %1248  ;;  %v1255_v26 = vpop.xlane.xlu1 %1254 }
 0x571   :  { %1999 = vpow2.f32 %v1280_v5  ;;  %v3018_v51 = vsub.f32 %v2910_v2, %v1249_v31  ;;  %v3021_v10 = vsub.f32 %v2915_v63, %v1255_v26 }
 0x572   :  { %2001 = vpow2.f32 %v1298_v54 }
 0x573   :  { %v1296_v13 = vmul.f32 1.442695, %v3018_v51  ;;  %v1302_v32 = vmul.f32 1.442695, %v3021_v10 }
 0x574   :  { %v1253_v17 = vpop.xlane.xlu0 %1252  ;;  %v1237_v46 = vpop.xlane.xlu1 %1236 }
 0x575   :  { %2003 = vpow2.f32 %v1296_v13  ;;  %v3027_v27 = vsub.f32 %v2937_v34, %v1237_v46  ;;  %v3030_v2 = vsub.f32 %v2933_v25, %v1253_v17 }
 0x576   :  { %2005 = vpow2.f32 %v1286_v22 }
 0x577   :  { %v1284_v63 = vmul.f32 1.442695, %v3027_v27  ;;  %2007 = vpow2.f32 %v1302_v32  ;;  %v1300_v44 = vmul.f32 1.442695, %v3030_v2 }
 0x578   :  { %v1243_v50 = vpop.xlane.xlu1 %1242  ;;  %v1241_v49 = vpop.xlane.xlu0 %1240 }
 0x579   :  { %v3034_v57 = vsub.f32 %v2958_v18, %v1243_v50  ;;  %2009 = vpow2.f32 %v1284_v63  ;;  %v3038_v47 = vsub.f32 %v2962_v1, %v1241_v49 }
 0x57a   :  { %v1998_v34 = vpop.eup %1997 }
 0x57b   :  { %v1290_v43 = vmul.f32 1.442695, %v3034_v57  ;;  %1314 = vadd.xlane.f32.xlu1 %v1998_v34  ;;  %v1288_v18 = vmul.f32 1.442695, %v3038_v47 }
 0x57c   :  { %v1259_v25 = vpop.xlane.xlu1 %1258  ;;  %v1257_v23 = vpop.xlane.xlu0 %1256 }
 0x57d   :  { %2011 = vpow2.f32 %v1290_v43  ;;  %v3041_v4 = vsub.f32 %v1229_v36, %v1259_v25  ;;  %v3044_v56 = vsub.f32 %v1228_v48, %v1257_v23 }
 0x57e   :  { %v2000_v24 = vpop.eup %1999  ;;  %2013 = vpow2.f32 %v1300_v44 }
 0x57f   :  { %v2002_v59 = vpop.eup %2001  ;;  %v1306_v58 = vmul.f32 1.442695, %v3041_v4  ;;  %1312 = vadd.xlane.f32.xlu0 %v2000_v24  ;;  %v1304_v15 = vmul.f32 1.442695, %v3044_v56 }
 0x580   :  { %1330 = vadd.xlane.f32.xlu1 %v2002_v59  ;;  %v1247_v1 = vpop.xlane.xlu1 %1246  ;;  %v1245_v45 = vpop.xlane.xlu0 %1244 }
 0x581   :  { %2015 = vpow2.f32 %v1306_v58  ;;  %v3048_v39 = vsub.f32 %v2984_v0, %v1247_v1  ;;  %v3052_v9 = vsub.f32 %v2988_v55, %v1245_v45 }
 0x582   :  { %v2004_v29 = vpop.eup %2003  ;;  %2017 = vpow2.f32 %v1288_v18 }
 0x583   :  { %v2006_v21 = vpop.eup %2005  ;;  %v1294_v35 = vmul.f32 1.442695, %v3048_v39  ;;  %1328 = vadd.xlane.f32.xlu0 %v2004_v29  ;;  %v1292_v7 = vmul.f32 1.442695, %v3052_v9 }
 0x584   :  { %1318 = vadd.xlane.f32.xlu1 %v2006_v21  ;;  %v1263_v30 = vpop.xlane.xlu1 %1262  ;;  %v1261_v19 = vpop.xlane.xlu0 %1260 }
 0x585   :  { %2019 = vpow2.f32 %v1294_v35  ;;  %v3056_v62 = vsub.f32 %v2994_v53, %v1263_v30  ;;  %v2008_v28 = vpop.eup %2007  ;;  %v3060_v3 = vsub.f32 %v2998_v42, %v1261_v19 }
 0x586   :  { %2021 = vpow2.f32 %v1304_v15  ;;  %v2010_v36 = vpop.eup %2009 }
 0x587   :  { %v1310_v48 = vmul.f32 1.442695, %v3056_v62  ;;  %1316 = vadd.xlane.f32.xlu0 %v2010_v36  ;;  %v1308_v8 = vmul.f32 1.442695, %v3060_v3 }
 0x588   :  { %1334 = vadd.xlane.f32.xlu1 %v2008_v28 }
 0x589   :  { %2023 = vpow2.f32 %v1310_v48 }
 0x58a   :  { %v2012_v12 = vpop.eup %2011  ;;  %2025 = vpow2.f32 %v1292_v7 }
 0x58b   :  { %v2014_v6 = vpop.eup %2013  ;;  %2027 = vpow2.f32 %v1308_v8 }
 0x58c   :  { %1322 = vadd.xlane.f32.xlu1 %v2012_v12  ;;  %1332 = vadd.xlane.f32.xlu0 %v2014_v6 }
 0x58e   :  { %v2016_v61 = vpop.eup %2015 }
 0x58f   :  { %v2018_v0 = vpop.eup %2017 }
 0x590   :  { %1338 = vadd.xlane.f32.xlu1 %v2016_v61  ;;  %1320 = vadd.xlane.f32.xlu0 %v2018_v0 }
 0x592   :  { %v2020_v55 = vpop.eup %2019 }
 0x593   :  { %v2022_v20 = vpop.eup %2021 }
 0x594   :  { %1326 = vadd.xlane.f32.xlu1 %v2020_v55  ;;  %1336 = vadd.xlane.f32.xlu0 %v2022_v20 }
 0x596   :  { %v2024_v14 = vpop.eup %2023 }
 0x597   :  { %v2026_v53 = vpop.eup %2025 }
 0x598   :  { %1342 = vadd.xlane.f32.xlu1 %v2024_v14  ;;  %1324 = vadd.xlane.f32.xlu0 %v2026_v53  ;;  %v2028_v42 = vpop.eup %2027 }
 0x59c   :  { %1340 = vadd.xlane.f32.xlu0 %v2028_v42 }
 0x604   :  { %v1315_v40 = vpop.xlane.xlu1 %1314 }
 0x605   :  { %2029 = vlog2.f32 %v1315_v40 }
 0x608   :  { %v1313_v60 = vpop.xlane.xlu0 %1312 }
 0x609   :  { %v1331_v41 = vpop.xlane.xlu1 %1330  ;;  %2031 = vlog2.f32 %v1313_v60 }
 0x60a   :  { %2033 = vlog2.f32 %v1331_v41 }
 0x60c   :  { %v1329_v11 = vpop.xlane.xlu0 %1328 }
 0x60d   :  { %v1319_v16 = vpop.xlane.xlu1 %1318  ;;  %2035 = vlog2.f32 %v1329_v11 }
 0x60e   :  { %2037 = vlog2.f32 %v1319_v16 }
 0x610   :  { %v1317_v5 = vpop.xlane.xlu0 %1316 }
 0x611   :  { %v1335_v54 = vpop.xlane.xlu1 %1334 }
 0x612   :  { %2039 = vlog2.f32 %v1335_v54  ;;  %v2030_v31 = vpop.eup %2029 }
 0x613   :  { %2041 = vlog2.f32 %v1317_v5  ;;  %v1347_v26 = vmul.f32 0.6931472, %v2030_v31 }
 0x615   :  { %v1323_v22 = vpop.xlane.xlu1 %1322  ;;  %v1333_v13 = vpop.xlane.xlu0 %1332  ;;  %v1377_v46 = vsub.f32 %v3003_v33, %v1347_v26 }
 0x616   :  { %v2032_v17 = vpop.eup %2031  ;;  %2043 = vlog2.f32 %v1323_v22 }
 0x617   :  { %v2034_v32 = vpop.eup %2033  ;;  %v1345_v63 = vmul.f32 0.6931472, %v2032_v17  ;;  %2045 = vlog2.f32 %v1333_v13  ;;  %1393 = vst [vmem:[#allocation10 + $0x8] sm:$0xff] %v1377_v46 }
 0x618   :  { %v1363_v50 = vmul.f32 0.6931472, %v2034_v32 }
 0x619   :  { %v1376_v49 = vsub.f32 %v3010_v38, %v1345_v63  ;;  %v1339_v44 = vpop.xlane.xlu1 %1338  ;;  %v1321_v34 = vpop.xlane.xlu0 %1320 }
 0x61a   :  { %v2036_v43 = vpop.eup %2035  ;;  %v1385_v25 = vsub.f32 %v3006_v52, %v1363_v50  ;;  %2047 = vlog2.f32 %v1339_v44 }
 0x61b   :  { %v2038_v23 = vpop.eup %2037  ;;  %1392 = vst [vmem:[#allocation10] sm:$0xff] %v1376_v49  ;;  %v1361_v24 = vmul.f32 0.6931472, %v2036_v43  ;;  %2049 = vlog2.f32 %v1321_v34 }
 0x61c   :  { %1401 = vst [vmem:[#allocation10 + $0x48] sm:$0xff] %v1385_v25  ;;  %v1351_v33 = vmul.f32 0.6931472, %v2038_v23 }
 0x61d   :  { %v1384_v18 = vsub.f32 %v3018_v51, %v1361_v24  ;;  %v1327_v59 = vpop.xlane.xlu1 %1326  ;;  %v1337_v58 = vpop.xlane.xlu0 %1336 }
 0x61e   :  { %v1379_v1 = vsub.f32 %v3014_v37, %v1351_v33  ;;  %2051 = vlog2.f32 %v1327_v59 }
 0x61f   :  { %v2040_v38 = vpop.eup %2039  ;;  %1400 = vst [vmem:[#allocation10 + $0x40] sm:$0xff] %v1384_v18  ;;  %2053 = vlog2.f32 %v1337_v58 }
 0x620   :  { %v2042_v45 = vpop.eup %2041  ;;  %1395 = vst [vmem:[#allocation10 + $0x18] sm:$0xff] %v1379_v1  ;;  %v1367_v52 = vmul.f32 0.6931472, %v2040_v38 }
 0x621   :  { %v1349_v29 = vmul.f32 0.6931472, %v2042_v45  ;;  %v1343_v15 = vpop.xlane.xlu1 %1342  ;;  %v1325_v21 = vpop.xlane.xlu0 %1324 }
 0x622   :  { %v1387_v35 = vsub.f32 %v3021_v10, %v1367_v52  ;;  %2055 = vlog2.f32 %v1343_v15 }
 0x623   :  { %v2044_v30 = vpop.eup %2043  ;;  %v1378_v51 = vsub.f32 %v3027_v27, %v1349_v29  ;;  %2057 = vlog2.f32 %v1325_v21 }
 0x624   :  { %v2046_v19 = vpop.eup %2045  ;;  %1403 = vst [vmem:[#allocation10 + $0x58] sm:$0xff] %v1387_v35  ;;  %v1355_v37 = vmul.f32 0.6931472, %v2044_v30 }
 0x625   :  { %1394 = vst [vmem:[#allocation10 + $0x10] sm:$0xff] %v1378_v51  ;;  %v1365_v28 = vmul.f32 0.6931472, %v2046_v19  ;;  %v1341_v7 = vpop.xlane.xlu0 %1340 }
 0x626   :  { %v1381_v36 = vsub.f32 %v3034_v57, %v1355_v37  ;;  %2059 = vlog2.f32 %v1341_v7 }
 0x627   :  { %v2048_v48 = vpop.eup %2047  ;;  %v1386_v12 = vsub.f32 %v3030_v2, %v1365_v28 }
 0x628   :  { %v2050_v8 = vpop.eup %2049  ;;  %1397 = vst [vmem:[#allocation10 + $0x28] sm:$0xff] %v1381_v36  ;;  %v1371_v10 = vmul.f32 0.6931472, %v2048_v48 }
 0x629   :  { %1402 = vst [vmem:[#allocation10 + $0x50] sm:$0xff] %v1386_v12  ;;  %v1353_v6 = vmul.f32 0.6931472, %v2050_v8 }
 0x62a   :  { %v1389_v27 = vsub.f32 %v3041_v4, %v1371_v10 }
 0x62b   :  { %v2052_v61 = vpop.eup %2051  ;;  %v1380_v0 = vsub.f32 %v3038_v47, %v1353_v6 }
 0x62c   :  { %v2054_v55 = vpop.eup %2053  ;;  %1405 = vst [vmem:[#allocation10 + $0x68] sm:$0xff] %v1389_v27  ;;  %v1359_v20 = vmul.f32 0.6931472, %v2052_v61 }
 0x62d   :  { %1396 = vst [vmem:[#allocation10 + $0x20] sm:$0xff] %v1380_v0  ;;  %v1369_v14 = vmul.f32 0.6931472, %v2054_v55 }
 0x62e   :  { %v1383_v57 = vsub.f32 %v3048_v39, %v1359_v20 }
 0x62f   :  { %v2056_v53 = vpop.eup %2055  ;;  %v1388_v2 = vsub.f32 %v3044_v56, %v1369_v14 }
 0x630   :  { %v2058_v42 = vpop.eup %2057  ;;  %1399 = vst [vmem:[#allocation10 + $0x38] sm:$0xff] %v1383_v57  ;;  %v1375_v40 = vmul.f32 0.6931472, %v2056_v53 }
 0x631   :  { %1404 = vst [vmem:[#allocation10 + $0x60] sm:$0xff] %v1388_v2  ;;  %v1357_v60 = vmul.f32 0.6931472, %v2058_v42 }
 0x632   :  { %v1391_v4 = vsub.f32 %v3056_v62, %v1375_v40 }
 0x633   :  { %v2060_v41 = vpop.eup %2059  ;;  %v1382_v47 = vsub.f32 %v3052_v9, %v1357_v60 }
 0x634   :  { %1407 = vst [vmem:[#allocation10 + $0x78] sm:$0xff] %v1391_v4  ;;  %v1373_v11 = vmul.f32 0.6931472, %v2060_v41 }
 0x635   :  { %1398 = vst [vmem:[#allocation10 + $0x30] sm:$0xff] %v1382_v47 }
 0x636   :  { %v1390_v39 = vsub.f32 %v3060_v3, %v1373_v11 }
 0x638   :  { %1406 = vst [vmem:[#allocation10 + $0x70] sm:$0xff] %v1390_v39 }
 0x639   :  { %2152 = shalt.err (!%p2149_p10)
}
 0x63a   :  { %1419 = dma.vmem_to_hbm [thread:$0]  %s1414_s2, 2048, %s3090_s4, [#allocation7], %s2172_s18, %s2172_s18, %s2173_s19  }
 0x63b   :  { %2169 = dma.done.wait [#allocation7], 2048  }
 0x63c   :  { %2170 = vsyncadd [#allocation7], 4294965248 }
 0x63d   :  { %1423 = vsyncpa [#allocation6], 1 }
 0x63e   :  { %1424 = vsyncpa [#allocation9], 1 }
 0x63f   :  { %1425 = vsyncpa [#allocation7], 1 }
 0x640   :  { %1426 = vsyncmov [#allocation4] }
 0x643   :  { %s1427_s12 = vpop.sfrf %1426 }
 0x644   :  { %p1444_p11 = scmp.ne.s32.totalorder %s1427_s12, 0 }
 0x646   :  { %1431 = shalt.err (%p1444_p11)  }
 0x647   :  { %1433 = vsyncmov [#allocation4 + $0x1] }
 0x64a   :  { %s1434_s13 = vpop.sfrf %1433 }
 0x64b   :  { %p1445_p12 = scmp.ne.s32.totalorder %s1434_s13, 0 }
 0x64d   :  { %1438 = shalt.err (%p1445_p12)  }

</bundles_post_ra>
